<compile_context>
chip_gen: v6e
topology: v6e:2x2x1
jax: 0.10.0
libtpu: 0.0.40
codegen_flags: <defaults>
</compile_context>

<pallas_src>
import functools
import math

import jax
import jax.numpy as jnp
from jax import lax
from jax.experimental import pallas as pl
from jax.experimental.pallas import tpu as pltpu

_LANE = 128
_SUBLANE = 8


def _round_up(x, m):
    return ((x + m - 1) // m) * m


def _sigmoid(x):
    # 1/(1+exp(-x)) == 0.5*(tanh(x/2)+1): tanh goes to the EUP slot,
    # avoiding a VALU divide on the serial critical path.
    return 0.5 * jnp.tanh(0.5 * x) + 0.5


def _make_gru_kernel(num_layers, seq_len, b_pad, hidden_dim, gpad, unroll):
    """Stacked GRU + final Linear, whole sequence in one kernel invocation."""
    T, Bp, H, G = seq_len, b_pad, hidden_dim, gpad
    n_layer_refs = 4 * num_layers

    def kernel(*refs):
        x_ref = refs[0]                               # (T*Bp, E) time-major, flattened
        layer_refs = refs[1:1 + n_layer_refs]         # 4 refs per layer
        fc_w_ref = refs[1 + n_layer_refs]             # (H, OPAD)
        fc_b_ref = refs[2 + n_layer_refs]             # (1, OPAD)
        out_ref = refs[3 + n_layer_refs]              # (Bp, OPAD)
        gates_ref, seq_ref = refs[4 + n_layer_refs:]  # (T*Bp, G) each

        # Lanes H..G of seq_ref are never written by the per-step stores but
        # ARE read by the next layer's batched GEMM (against zero weight
        # rows); zero them once so uninitialized NaNs can't poison the GEMM.
        if num_layers > 1:
            seq_ref[...] = jnp.zeros((T * Bp, G), jnp.float32)

        h_last = jnp.zeros((Bp, H), jnp.float32)

        for l in range(num_layers):
            w_if_ref, w_hf_ref, b_if_ref, b_hn_ref = layer_refs[4 * l:4 * l + 4]

            # Hoist loop-invariant reads/broadcasts out of the time loop.
            # (At H=32 the fused recurrent weight is ~4 vregs; for H >= 128
            # keep it as a ref read inside `step` instead to avoid pinning
            # ~48 vregs across an unrolled loop.)
            w_hf = w_hf_ref[...]                                   # (H, G)
            b_hn_b = jnp.broadcast_to(b_hn_ref[...], (Bp, H))      # (Bp, H)

            # Layer input: embedded tokens for layer 0, previous layer's
            # output sequence otherwise.
            inp = x_ref[...] if l == 0 else seq_ref[...]

            # Batched, fused input projection for ALL timesteps: one GEMM,
            # lane-dense (T*Bp, G) store. Fused bias layout:
            # [b_ir+b_hr | b_iz+b_hz | b_in | 0]; b_hn stays inside the
            # reset-gate product below.
            gates_ref[...] = (
                jnp.dot(inp, w_if_ref[...], preferred_element_type=jnp.float32)
                + b_if_ref[...]
            )

            write_seq = (l != num_layers - 1)

            def step(t, h, _write_seq=write_seq, w_hf=w_hf, b_hn_b=b_hn_b):
                row = pl.multiple_of(t * Bp, Bp)      # Bp is a multiple of 8
                gx = gates_ref[pl.ds(row, Bp), :]     # (Bp, G) lane-dense load
                # Single fused recurrent matmul: one MXU push per timestep.
                gh = jnp.dot(h, w_hf, preferred_element_type=jnp.float32)
                r = _sigmoid(gx[:, 0:H] + gh[:, 0:H])
                z = _sigmoid(gx[:, H:2 * H] + gh[:, H:2 * H])
                n = jnp.tanh(gx[:, 2 * H:3 * H]
                             + r * (gh[:, 2 * H:3 * H] + b_hn_b))
                h_new = (1.0 - z) * n + z * h
                if _write_seq:
                    seq_ref[pl.ds(row, Bp), 0:H] = h_new
                return h_new

            h_last = lax.fori_loop(0, T, step,
                                   jnp.zeros((Bp, H), jnp.float32),
                                   unroll=unroll)

        # Last timestep -> Dropout(p=0) is identity -> Linear (lane-dense
        # 128-padded output; real columns sliced out on the host).
        out_ref[...] = (
            jnp.dot(h_last, fc_w_ref[...], preferred_element_type=jnp.float32)
            + fc_b_ref[...]
        )

    return kernel


def _estimate_vmem_bytes(T, Bp, E, H, G, opad, num_layers):
    f = 4
    total = T * Bp * E * f                 # x2d input
    total += 2 * T * Bp * G * f            # gates + seq scratch
    for l in range(num_layers):
        in_pad = E if l == 0 else G
        total += (in_pad * G + H * G + G + H) * f
    total += (H * opad + opad + Bp * opad) * f
    return total


def gru_pallas_forward(tokens, params, *, num_layers, hidden_dim, output_size,
                       unroll=8):
    """Forward pass matching GRU.forward(input_ids, lengths=None)."""
    # Embedding gather + time-major layout + batch padding in plain JAX.
    emb = params["embedding"][tokens]                 # (B, T, E) float32
    B, T, E = emb.shape
    Bp = _round_up(max(B, _SUBLANE), _SUBLANE)
    G = _round_up(3 * hidden_dim, _LANE)

    x = jnp.transpose(emb, (1, 0, 2))                 # (T, B, E) time-major
    x = jnp.pad(x, ((0, 0), (0, Bp - B), (0, 0)))     # pad batch to sublane tile
    x2d = x.reshape(T * Bp, E)                        # 8-row-aligned per timestep

    inputs = [x2d]
    for l in range(num_layers):
        inputs += [
            params[f"w_if_l{l}"], params[f"w_hf_l{l}"],
            params[f"b_if_l{l}"], params[f"b_hn_l{l}"],
        ]
    inputs += [params["fc_w_pad"], params["fc_b_pad"]]
    opad = params["fc_w_pad"].shape[1]

    est = _estimate_vmem_bytes(T, Bp, E, hidden_dim, G, opad, num_layers)
    vmem_limit = int(min(100 * 2**20, max(16 * 2**20, 4 * est)))
    unroll_eff = max(1, min(unroll, T))

    out_pad = pl.pallas_call(
        _make_gru_kernel(num_layers, T, Bp, hidden_dim, G, unroll_eff),
        out_shape=jax.ShapeDtypeStruct((Bp, opad), jnp.float32),
        in_specs=[pl.BlockSpec(memory_space=pltpu.MemorySpace.VMEM)] * len(inputs),
        out_specs=pl.BlockSpec(memory_space=pltpu.MemorySpace.VMEM),
        scratch_shapes=[pltpu.VMEM((T * Bp, G), jnp.float32) for _ in range(2)],
        compiler_params=pltpu.CompilerParams(vmem_limit_bytes=vmem_limit),
    )(*inputs)
    return out_pad[:B, :output_size]


# ---------------------------------------------------------------------------
# Parameter construction (torch layout), packing for the kernel, and a
# pure-JAX reference with exact PyTorch nn.GRU semantics.
# ---------------------------------------------------------------------------

def init_torch_params(key, *, input_size, output_size, embedding_dim,
                      hidden_dim, num_layers):
    H = hidden_dim
    keys = jax.random.split(key, 1 + 4 * num_layers + 2)
    tp = {}
    tp["embedding"] = jax.random.normal(keys[0], (input_size, embedding_dim),
                                        jnp.float32)
    s = 1.0 / math.sqrt(H)
    k = 1
    for l in range(num_layers):
        in_dim = embedding_dim if l == 0 else H
        tp[f"weight_ih_l{l}"] = jax.random.uniform(
            keys[k], (3 * H, in_dim), jnp.float32, -s, s)
        tp[f"weight_hh_l{l}"] = jax.random.uniform(
            keys[k + 1], (3 * H, H), jnp.float32, -s, s)
        tp[f"bias_ih_l{l}"] = jax.random.uniform(
            keys[k + 2], (3 * H,), jnp.float32, -s, s)
        tp[f"bias_hh_l{l}"] = jax.random.uniform(
            keys[k + 3], (3 * H,), jnp.float32, -s, s)
        k += 4
    s_fc = 1.0 / math.sqrt(H)
    tp["fc_weight"] = jax.random.uniform(
        keys[k], (output_size, H), jnp.float32, -s_fc, s_fc)
    tp["fc_bias"] = jax.random.uniform(
        keys[k + 1], (output_size,), jnp.float32, -s_fc, s_fc)
    return tp


def pack_params(tp, *, num_layers, hidden_dim, embedding_dim, output_size):
    """Fuse + transpose gate weights host-side, fold additive biases, pad to
    lane-dense widths (gates to GPAD=round_up(3H,128), FC to 128)."""
    H = hidden_dim
    G = _round_up(3 * H, _LANE)
    p = {"embedding": tp["embedding"]}
    for l in range(num_layers):
        in_dim = embedding_dim if l == 0 else H
        # Layer-0 input comes straight from the embedding (E columns); deeper
        # layers read the lane-dense (T*Bp, G) seq buffer, so pad their
        # input-weight rows to G with zeros (padded lanes contribute nothing).
        in_pad = in_dim if l == 0 else G
        w_ih = tp[f"weight_ih_l{l}"]          # (3H, in) rows: [r | z | n]
        w_hh = tp[f"weight_hh_l{l}"]          # (3H, H)
        b_ih = tp[f"bias_ih_l{l}"]            # (3H,)
        b_hh = tp[f"bias_hh_l{l}"]            # (3H,)

        w_if = jnp.zeros((in_pad, G), jnp.float32)
        w_if = w_if.at[:in_dim, 0:H].set(w_ih[0:H].T)
        w_if = w_if.at[:in_dim, H:2 * H].set(w_ih[H:2 * H].T)
        w_if = w_if.at[:in_dim, 2 * H:3 * H].set(w_ih[2 * H:].T)

        w_hf = jnp.zeros((H, G), jnp.float32)
        w_hf = w_hf.at[:, 0:H].set(w_hh[0:H].T)
        w_hf = w_hf.at[:, H:2 * H].set(w_hh[H:2 * H].T)
        w_hf = w_hf.at[:, 2 * H:3 * H].set(w_hh[2 * H:].T)

        b_if = jnp.zeros((1, G), jnp.float32)
        b_if = b_if.at[0, 0:H].set(b_ih[0:H] + b_hh[0:H])
        b_if = b_if.at[0, H:2 * H].set(b_ih[H:2 * H] + b_hh[H:2 * H])
        b_if = b_if.at[0, 2 * H:3 * H].set(b_ih[2 * H:])

        p[f"w_if_l{l}"] = w_if
        p[f"w_hf_l{l}"] = w_hf
        p[f"b_if_l{l}"] = b_if
        p[f"b_hn_l{l}"] = b_hh[2 * H:].reshape(1, H)

    opad = _round_up(output_size, _LANE)
    fc_w = tp["fc_weight"].T                  # (H, O)
    p["fc_w_pad"] = jnp.zeros((H, opad), jnp.float32).at[:, :output_size].set(fc_w)
    p["fc_b_pad"] = jnp.zeros((1, opad), jnp.float32).at[0, :output_size].set(
        tp["fc_bias"])
    return p


def _reference_forward(tokens, tp, *, num_layers):
    """Pure-JAX reference with exact PyTorch nn.GRU semantics."""
    emb = tp["embedding"][tokens]             # (B, T, E)
    B, T, _ = emb.shape
    x = jnp.transpose(emb, (1, 0, 2))         # (T, B, E)
    H = tp["weight_hh_l0"].shape[1]
    for l in range(num_layers):
        w_ih = tp[f"weight_ih_l{l}"]
        w_hh = tp[f"weight_hh_l{l}"]
        b_ih = tp[f"bias_ih_l{l}"]
        b_hh = tp[f"bias_hh_l{l}"]

        def step(h, x_t, w_ih=w_ih, w_hh=w_hh, b_ih=b_ih, b_hh=b_hh):
            gi = x_t @ w_ih.T + b_ih          # (B, 3H)
            gh = h @ w_hh.T + b_hh            # (B, 3H)
            i_r, i_z, i_n = jnp.split(gi, 3, axis=-1)
            h_r, h_z, h_n = jnp.split(gh, 3, axis=-1)
            r = jax.nn.sigmoid(i_r + h_r)
            z = jax.nn.sigmoid(i_z + h_z)
            n = jnp.tanh(i_n + r * h_n)
            h_new = (1.0 - z) * n + z * h
            return h_new, h_new

        h0 = jnp.zeros((B, H), jnp.float32)
        _, hs = lax.scan(step, h0, x)
        x = hs                                # (T, B, H)
    last = x[-1]                              # (B, H)  == out[:, -1, :]
    return last @ tp["fc_weight"].T + tp["fc_bias"]


if __name__ == "__main__":
    # Small, module-consistent shapes.
    input_size = 50        # vocab size
    output_size = 5
    embedding_dim = 32
    hidden_dim = 32
    num_layers = 2
    batch = 2
    seq = 8

    key = jax.random.PRNGKey(0)
    pkey, tkey = jax.random.split(key)
    torch_params = init_torch_params(
        pkey,
        input_size=input_size,
        output_size=output_size,
        embedding_dim=embedding_dim,
        hidden_dim=hidden_dim,
        num_layers=num_layers,
    )
    params = pack_params(torch_params, num_layers=num_layers,
                         hidden_dim=hidden_dim, embedding_dim=embedding_dim,
                         output_size=output_size)
    tokens = jax.random.randint(tkey, (batch, seq), 0, input_size, jnp.int32)

    fwd = jax.jit(
        functools.partial(
            gru_pallas_forward,
            num_layers=num_layers,
            hidden_dim=hidden_dim,
            output_size=output_size,
        )
    )
    out = jax.block_until_ready(fwd(tokens, params))

    ref = _reference_forward(tokens, torch_params, num_layers=num_layers)
    assert out.shape == (batch, output_size), out.shape
    assert jnp.allclose(out, ref, atol=5e-5, rtol=5e-5), (out, ref)

    print("KERNEL_OK")
</pallas_src>

<mosaic_0001>
module attributes {stable_mosaic.version = 11 : i64} {
  func.func @kernel(%arg0: memref<64x32xf32, #tpu.memory_space<vmem>>, %arg1: memref<32x128xf32, #tpu.memory_space<vmem>>, %arg2: memref<32x128xf32, #tpu.memory_space<vmem>>, %arg3: memref<1x128xf32, #tpu.memory_space<vmem>>, %arg4: memref<1x32xf32, #tpu.memory_space<vmem>>, %arg5: memref<128x128xf32, #tpu.memory_space<vmem>>, %arg6: memref<32x128xf32, #tpu.memory_space<vmem>>, %arg7: memref<1x128xf32, #tpu.memory_space<vmem>>, %arg8: memref<1x32xf32, #tpu.memory_space<vmem>>, %arg9: memref<32x128xf32, #tpu.memory_space<vmem>>, %arg10: memref<1x128xf32, #tpu.memory_space<vmem>>, %arg11: memref<8x128xf32, #tpu.memory_space<vmem>>, %arg12: memref<64x128xf32, #tpu.memory_space<vmem>>, %arg13: memref<64x128xf32, #tpu.memory_space<vmem>>) attributes {dimension_semantics = [], scalar_prefetch = 0 : i64, scratch_operands = 2 : i64, tpu.core_type = #tpu.core_type<tc>} {
    %cst = arith.constant 0.000000e+00 : f32
    %0 = vector.broadcast %cst : f32 to vector<64x128xf32>
    %c0 = arith.constant 0 : index
    %c0_0 = arith.constant 0 : index
    %1 = vector.load %arg13[%c0, %c0_0] : memref<64x128xf32, #tpu.memory_space<vmem>>, vector<64x128xf32>
    tpu.vector_store %arg13[%c0, %c0_0], %0 {strides = array<i32>} : memref<64x128xf32, #tpu.memory_space<vmem>>, vector<64x128xf32>,
    %c0_1 = arith.constant 0 : index
    %c0_2 = arith.constant 0 : index
    %2 = vector.load %arg2[%c0_1, %c0_2] : memref<32x128xf32, #tpu.memory_space<vmem>>, vector<32x128xf32>
    %c0_3 = arith.constant 0 : index
    %c0_4 = arith.constant 0 : index
    %3 = vector.load %arg4[%c0_3, %c0_4] : memref<1x32xf32, #tpu.memory_space<vmem>>, vector<1x32xf32>
    %4 = vector.shape_cast %3 : vector<1x32xf32> to vector<1x32xf32>
    %5 = vector.broadcast %4 : vector<1x32xf32> to vector<8x32xf32>
    %c0_5 = arith.constant 0 : index
    %c0_6 = arith.constant 0 : index
    %6 = vector.load %arg0[%c0_5, %c0_6] : memref<64x32xf32, #tpu.memory_space<vmem>>, vector<64x32xf32>
    %c0_7 = arith.constant 0 : index
    %c0_8 = arith.constant 0 : index
    %7 = vector.load %arg1[%c0_7, %c0_8] : memref<32x128xf32, #tpu.memory_space<vmem>>, vector<32x128xf32>
    %cst_9 = arith.constant dense<0.000000e+00> : vector<64x128xf32>
    %8 = tpu.matmul %6, %7, %cst_9 {dimension_numbers = #tpu.dot_dimension_numbers<[1], [0], [0], [1], [0, 0, 1, 1], [], []>} : vector<64x32xf32>, vector<32x128xf32>, vector<64x128xf32> -> vector<64x128xf32>
    %c0_10 = arith.constant 0 : index
    %c0_11 = arith.constant 0 : index
    %9 = vector.load %arg3[%c0_10, %c0_11] : memref<1x128xf32, #tpu.memory_space<vmem>>, vector<1x128xf32>
    %10 = vector.broadcast %9 : vector<1x128xf32> to vector<64x128xf32>
    %11 = arith.addf %8, %10 : vector<64x128xf32>
    %c0_12 = arith.constant 0 : index
    %c0_13 = arith.constant 0 : index
    %12 = vector.load %arg12[%c0_12, %c0_13] : memref<64x128xf32, #tpu.memory_space<vmem>>, vector<64x128xf32>
    tpu.vector_store %arg12[%c0_12, %c0_13], %11 {strides = array<i32>} : memref<64x128xf32, #tpu.memory_space<vmem>>, vector<64x128xf32>,
    %cst_14 = arith.constant 0.000000e+00 : f32
    %13 = vector.broadcast %cst_14 : f32 to vector<8x32xf32>
    %c0_i32 = arith.constant 0 : i32
    %c8_i32 = arith.constant 8 : i32
    %14 = arith.muli %c0_i32, %c8_i32 : i32
    %15 = tpu.assume_multiple %14, 8 : i32
    %16 = arith.index_cast %15 : i32 to index
    %c0_15 = arith.constant 0 : index
    %17 = vector.load %arg12[%16, %c0_15] : memref<64x128xf32, #tpu.memory_space<vmem>>, vector<8x128xf32>
    %cst_16 = arith.constant dense<0.000000e+00> : vector<8x128xf32>
    %18 = tpu.matmul %13, %2, %cst_16 {dimension_numbers = #tpu.dot_dimension_numbers<[1], [0], [0], [1], [0, 0, 1, 1], [], []>} : vector<8x32xf32>, vector<32x128xf32>, vector<8x128xf32> -> vector<8x128xf32>
    %19 = vector.extract_strided_slice %17 {offsets = [0, 0], sizes = [8, 32], strides = [1, 1]} : vector<8x128xf32> to vector<8x32xf32>
    %20 = vector.extract_strided_slice %18 {offsets = [0, 0], sizes = [8, 32], strides = [1, 1]} : vector<8x128xf32> to vector<8x32xf32>
    %21 = arith.addf %19, %20 : vector<8x32xf32>
    %cst_17 = arith.constant 5.000000e-01 : f32
    %22 = vector.broadcast %cst_17 : f32 to vector<8x32xf32>
    %23 = arith.mulf %22, %21 : vector<8x32xf32>
    %24 = math.tanh %23 : vector<8x32xf32>
    %cst_18 = arith.constant 5.000000e-01 : f32
    %25 = vector.broadcast %cst_18 : f32 to vector<8x32xf32>
    %26 = arith.mulf %25, %24 : vector<8x32xf32>
    %cst_19 = arith.constant 5.000000e-01 : f32
    %27 = vector.broadcast %cst_19 : f32 to vector<8x32xf32>
    %28 = arith.addf %26, %27 : vector<8x32xf32>
    %29 = vector.extract_strided_slice %17 {offsets = [0, 32], sizes = [8, 32], strides = [1, 1]} : vector<8x128xf32> to vector<8x32xf32>
    %30 = vector.extract_strided_slice %18 {offsets = [0, 32], sizes = [8, 32], strides = [1, 1]} : vector<8x128xf32> to vector<8x32xf32>
    %31 = arith.addf %29, %30 : vector<8x32xf32>
    %cst_20 = arith.constant 5.000000e-01 : f32
    %32 = vector.broadcast %cst_20 : f32 to vector<8x32xf32>
    %33 = arith.mulf %32, %31 : vector<8x32xf32>
    %34 = math.tanh %33 : vector<8x32xf32>
    %cst_21 = arith.constant 5.000000e-01 : f32
    %35 = vector.broadcast %cst_21 : f32 to vector<8x32xf32>
    %36 = arith.mulf %35, %34 : vector<8x32xf32>
    %cst_22 = arith.constant 5.000000e-01 : f32
    %37 = vector.broadcast %cst_22 : f32 to vector<8x32xf32>
    %38 = arith.addf %36, %37 : vector<8x32xf32>
    %39 = vector.extract_strided_slice %17 {offsets = [0, 64], sizes = [8, 32], strides = [1, 1]} : vector<8x128xf32> to vector<8x32xf32>
    %40 = vector.extract_strided_slice %18 {offsets = [0, 64], sizes = [8, 32], strides = [1, 1]} : vector<8x128xf32> to vector<8x32xf32>
    %41 = arith.addf %40, %5 : vector<8x32xf32>
    %42 = arith.mulf %28, %41 : vector<8x32xf32>
    %43 = arith.addf %39, %42 : vector<8x32xf32>
    %44 = math.tanh %43 : vector<8x32xf32>
    %cst_23 = arith.constant 1.000000e+00 : f32
    %45 = vector.broadcast %cst_23 : f32 to vector<8x32xf32>
    %46 = arith.subf %45, %38 : vector<8x32xf32>
    %47 = arith.mulf %46, %44 : vector<8x32xf32>
    %48 = arith.mulf %38, %13 : vector<8x32xf32>
    %49 = arith.addf %47, %48 : vector<8x32xf32>
    %50 = arith.index_cast %15 : i32 to index
    %c0_24 = arith.constant 0 : index
    %51 = vector.load %arg13[%50, %c0_24] : memref<64x128xf32, #tpu.memory_space<vmem>>, vector<8x32xf32>
    tpu.vector_store %arg13[%50, %c0_24], %49 {strides = array<i32>} : memref<64x128xf32, #tpu.memory_space<vmem>>, vector<8x32xf32>,
    %c1_i32 = arith.constant 1 : i32
    %c8_i32_25 = arith.constant 8 : i32
    %52 = arith.muli %c1_i32, %c8_i32_25 : i32
    %53 = tpu.assume_multiple %52, 8 : i32
    %54 = arith.index_cast %53 : i32 to index
    %c0_26 = arith.constant 0 : index
    %55 = vector.load %arg12[%54, %c0_26] : memref<64x128xf32, #tpu.memory_space<vmem>>, vector<8x128xf32>
    %cst_27 = arith.constant dense<0.000000e+00> : vector<8x128xf32>
    %56 = tpu.matmul %49, %2, %cst_27 {dimension_numbers = #tpu.dot_dimension_numbers<[1], [0], [0], [1], [0, 0, 1, 1], [], []>} : vector<8x32xf32>, vector<32x128xf32>, vector<8x128xf32> -> vector<8x128xf32>
    %57 = vector.extract_strided_slice %55 {offsets = [0, 0], sizes = [8, 32], strides = [1, 1]} : vector<8x128xf32> to vector<8x32xf32>
    %58 = vector.extract_strided_slice %56 {offsets = [0, 0], sizes = [8, 32], strides = [1, 1]} : vector<8x128xf32> to vector<8x32xf32>
    %59 = arith.addf %57, %58 : vector<8x32xf32>
    %cst_28 = arith.constant 5.000000e-01 : f32
    %60 = vector.broadcast %cst_28 : f32 to vector<8x32xf32>
    %61 = arith.mulf %60, %59 : vector<8x32xf32>
    %62 = math.tanh %61 : vector<8x32xf32>
    %cst_29 = arith.constant 5.000000e-01 : f32
    %63 = vector.broadcast %cst_29 : f32 to vector<8x32xf32>
    %64 = arith.mulf %63, %62 : vector<8x32xf32>
    %cst_30 = arith.constant 5.000000e-01 : f32
    %65 = vector.broadcast %cst_30 : f32 to vector<8x32xf32>
    %66 = arith.addf %64, %65 : vector<8x32xf32>
    %67 = vector.extract_strided_slice %55 {offsets = [0, 32], sizes = [8, 32], strides = [1, 1]} : vector<8x128xf32> to vector<8x32xf32>
    %68 = vector.extract_strided_slice %56 {offsets = [0, 32], sizes = [8, 32], strides = [1, 1]} : vector<8x128xf32> to vector<8x32xf32>
    %69 = arith.addf %67, %68 : vector<8x32xf32>
    %cst_31 = arith.constant 5.000000e-01 : f32
    %70 = vector.broadcast %cst_31 : f32 to vector<8x32xf32>
    %71 = arith.mulf %70, %69 : vector<8x32xf32>
    %72 = math.tanh %71 : vector<8x32xf32>
    %cst_32 = arith.constant 5.000000e-01 : f32
    %73 = vector.broadcast %cst_32 : f32 to vector<8x32xf32>
    %74 = arith.mulf %73, %72 : vector<8x32xf32>
    %cst_33 = arith.constant 5.000000e-01 : f32
    %75 = vector.broadcast %cst_33 : f32 to vector<8x32xf32>
    %76 = arith.addf %74, %75 : vector<8x32xf32>
    %77 = vector.extract_strided_slice %55 {offsets = [0, 64], sizes = [8, 32], strides = [1, 1]} : vector<8x128xf32> to vector<8x32xf32>
    %78 = vector.extract_strided_slice %56 {offsets = [0, 64], sizes = [8, 32], strides = [1, 1]} : vector<8x128xf32> to vector<8x32xf32>
    %79 = arith.addf %78, %5 : vector<8x32xf32>
    %80 = arith.mulf %66, %79 : vector<8x32xf32>
    %81 = arith.addf %77, %80 : vector<8x32xf32>
    %82 = math.tanh %81 : vector<8x32xf32>
    %cst_34 = arith.constant 1.000000e+00 : f32
    %83 = vector.broadcast %cst_34 : f32 to vector<8x32xf32>
    %84 = arith.subf %83, %76 : vector<8x32xf32>
    %85 = arith.mulf %84, %82 : vector<8x32xf32>
    %86 = arith.mulf %76, %49 : vector<8x32xf32>
    %87 = arith.addf %85, %86 : vector<8x32xf32>
    %88 = arith.index_cast %53 : i32 to index
    %c0_35 = arith.constant 0 : index
    %89 = vector.load %arg13[%88, %c0_35] : memref<64x128xf32, #tpu.memory_space<vmem>>, vector<8x32xf32>
    tpu.vector_store %arg13[%88, %c0_35], %87 {strides = array<i32>} : memref<64x128xf32, #tpu.memory_space<vmem>>, vector<8x32xf32>,
    %c2_i32 = arith.constant 2 : i32
    %c8_i32_36 = arith.constant 8 : i32
    %90 = arith.muli %c2_i32, %c8_i32_36 : i32
    %91 = tpu.assume_multiple %90, 8 : i32
    %92 = arith.index_cast %91 : i32 to index
    %c0_37 = arith.constant 0 : index
    %93 = vector.load %arg12[%92, %c0_37] : memref<64x128xf32, #tpu.memory_space<vmem>>, vector<8x128xf32>
    %cst_38 = arith.constant dense<0.000000e+00> : vector<8x128xf32>
    %94 = tpu.matmul %87, %2, %cst_38 {dimension_numbers = #tpu.dot_dimension_numbers<[1], [0], [0], [1], [0, 0, 1, 1], [], []>} : vector<8x32xf32>, vector<32x128xf32>, vector<8x128xf32> -> vector<8x128xf32>
    %95 = vector.extract_strided_slice %93 {offsets = [0, 0], sizes = [8, 32], strides = [1, 1]} : vector<8x128xf32> to vector<8x32xf32>
    %96 = vector.extract_strided_slice %94 {offsets = [0, 0], sizes = [8, 32], strides = [1, 1]} : vector<8x128xf32> to vector<8x32xf32>
    %97 = arith.addf %95, %96 : vector<8x32xf32>
    %cst_39 = arith.constant 5.000000e-01 : f32
    %98 = vector.broadcast %cst_39 : f32 to vector<8x32xf32>
    %99 = arith.mulf %98, %97 : vector<8x32xf32>
    %100 = math.tanh %99 : vector<8x32xf32>
    %cst_40 = arith.constant 5.000000e-01 : f32
    %101 = vector.broadcast %cst_40 : f32 to vector<8x32xf32>
    %102 = arith.mulf %101, %100 : vector<8x32xf32>
    %cst_41 = arith.constant 5.000000e-01 : f32
    %103 = vector.broadcast %cst_41 : f32 to vector<8x32xf32>
    %104 = arith.addf %102, %103 : vector<8x32xf32>
    %105 = vector.extract_strided_slice %93 {offsets = [0, 32], sizes = [8, 32], strides = [1, 1]} : vector<8x128xf32> to vector<8x32xf32>
    %106 = vector.extract_strided_slice %94 {offsets = [0, 32], sizes = [8, 32], strides = [1, 1]} : vector<8x128xf32> to vector<8x32xf32>
    %107 = arith.addf %105, %106 : vector<8x32xf32>
    %cst_42 = arith.constant 5.000000e-01 : f32
    %108 = vector.broadcast %cst_42 : f32 to vector<8x32xf32>
    %109 = arith.mulf %108, %107 : vector<8x32xf32>
    %110 = math.tanh %109 : vector<8x32xf32>
    %cst_43 = arith.constant 5.000000e-01 : f32
    %111 = vector.broadcast %cst_43 : f32 to vector<8x32xf32>
    %112 = arith.mulf %111, %110 : vector<8x32xf32>
    %cst_44 = arith.constant 5.000000e-01 : f32
    %113 = vector.broadcast %cst_44 : f32 to vector<8x32xf32>
    %114 = arith.addf %112, %113 : vector<8x32xf32>
    %115 = vector.extract_strided_slice %93 {offsets = [0, 64], sizes = [8, 32], strides = [1, 1]} : vector<8x128xf32> to vector<8x32xf32>
    %116 = vector.extract_strided_slice %94 {offsets = [0, 64], sizes = [8, 32], strides = [1, 1]} : vector<8x128xf32> to vector<8x32xf32>
    %117 = arith.addf %116, %5 : vector<8x32xf32>
    %118 = arith.mulf %104, %117 : vector<8x32xf32>
    %119 = arith.addf %115, %118 : vector<8x32xf32>
    %120 = math.tanh %119 : vector<8x32xf32>
    %cst_45 = arith.constant 1.000000e+00 : f32
    %121 = vector.broadcast %cst_45 : f32 to vector<8x32xf32>
    %122 = arith.subf %121, %114 : vector<8x32xf32>
    %123 = arith.mulf %122, %120 : vector<8x32xf32>
    %124 = arith.mulf %114, %87 : vector<8x32xf32>
    %125 = arith.addf %123, %124 : vector<8x32xf32>
    %126 = arith.index_cast %91 : i32 to index
    %c0_46 = arith.constant 0 : index
    %127 = vector.load %arg13[%126, %c0_46] : memref<64x128xf32, #tpu.memory_space<vmem>>, vector<8x32xf32>
    tpu.vector_store %arg13[%126, %c0_46], %125 {strides = array<i32>} : memref<64x128xf32, #tpu.memory_space<vmem>>, vector<8x32xf32>,
    %c3_i32 = arith.constant 3 : i32
    %c8_i32_47 = arith.constant 8 : i32
    %128 = arith.muli %c3_i32, %c8_i32_47 : i32
    %129 = tpu.assume_multiple %128, 8 : i32
    %130 = arith.index_cast %129 : i32 to index
    %c0_48 = arith.constant 0 : index
    %131 = vector.load %arg12[%130, %c0_48] : memref<64x128xf32, #tpu.memory_space<vmem>>, vector<8x128xf32>
    %cst_49 = arith.constant dense<0.000000e+00> : vector<8x128xf32>
    %132 = tpu.matmul %125, %2, %cst_49 {dimension_numbers = #tpu.dot_dimension_numbers<[1], [0], [0], [1], [0, 0, 1, 1], [], []>} : vector<8x32xf32>, vector<32x128xf32>, vector<8x128xf32> -> vector<8x128xf32>
    %133 = vector.extract_strided_slice %131 {offsets = [0, 0], sizes = [8, 32], strides = [1, 1]} : vector<8x128xf32> to vector<8x32xf32>
    %134 = vector.extract_strided_slice %132 {offsets = [0, 0], sizes = [8, 32], strides = [1, 1]} : vector<8x128xf32> to vector<8x32xf32>
    %135 = arith.addf %133, %134 : vector<8x32xf32>
    %cst_50 = arith.constant 5.000000e-01 : f32
    %136 = vector.broadcast %cst_50 : f32 to vector<8x32xf32>
    %137 = arith.mulf %136, %135 : vector<8x32xf32>
    %138 = math.tanh %137 : vector<8x32xf32>
    %cst_51 = arith.constant 5.000000e-01 : f32
    %139 = vector.broadcast %cst_51 : f32 to vector<8x32xf32>
    %140 = arith.mulf %139, %138 : vector<8x32xf32>
    %cst_52 = arith.constant 5.000000e-01 : f32
    %141 = vector.broadcast %cst_52 : f32 to vector<8x32xf32>
    %142 = arith.addf %140, %141 : vector<8x32xf32>
    %143 = vector.extract_strided_slice %131 {offsets = [0, 32], sizes = [8, 32], strides = [1, 1]} : vector<8x128xf32> to vector<8x32xf32>
    %144 = vector.extract_strided_slice %132 {offsets = [0, 32], sizes = [8, 32], strides = [1, 1]} : vector<8x128xf32> to vector<8x32xf32>
    %145 = arith.addf %143, %144 : vector<8x32xf32>
    %cst_53 = arith.constant 5.000000e-01 : f32
    %146 = vector.broadcast %cst_53 : f32 to vector<8x32xf32>
    %147 = arith.mulf %146, %145 : vector<8x32xf32>
    %148 = math.tanh %147 : vector<8x32xf32>
    %cst_54 = arith.constant 5.000000e-01 : f32
    %149 = vector.broadcast %cst_54 : f32 to vector<8x32xf32>
    %150 = arith.mulf %149, %148 : vector<8x32xf32>
    %cst_55 = arith.constant 5.000000e-01 : f32
    %151 = vector.broadcast %cst_55 : f32 to vector<8x32xf32>
    %152 = arith.addf %150, %151 : vector<8x32xf32>
    %153 = vector.extract_strided_slice %131 {offsets = [0, 64], sizes = [8, 32], strides = [1, 1]} : vector<8x128xf32> to vector<8x32xf32>
    %154 = vector.extract_strided_slice %132 {offsets = [0, 64], sizes = [8, 32], strides = [1, 1]} : vector<8x128xf32> to vector<8x32xf32>
    %155 = arith.addf %154, %5 : vector<8x32xf32>
    %156 = arith.mulf %142, %155 : vector<8x32xf32>
    %157 = arith.addf %153, %156 : vector<8x32xf32>
    %158 = math.tanh %157 : vector<8x32xf32>
    %cst_56 = arith.constant 1.000000e+00 : f32
    %159 = vector.broadcast %cst_56 : f32 to vector<8x32xf32>
    %160 = arith.subf %159, %152 : vector<8x32xf32>
    %161 = arith.mulf %160, %158 : vector<8x32xf32>
    %162 = arith.mulf %152, %125 : vector<8x32xf32>
    %163 = arith.addf %161, %162 : vector<8x32xf32>
    %164 = arith.index_cast %129 : i32 to index
    %c0_57 = arith.constant 0 : index
    %165 = vector.load %arg13[%164, %c0_57] : memref<64x128xf32, #tpu.memory_space<vmem>>, vector<8x32xf32>
    tpu.vector_store %arg13[%164, %c0_57], %163 {strides = array<i32>} : memref<64x128xf32, #tpu.memory_space<vmem>>, vector<8x32xf32>,
    %c4_i32 = arith.constant 4 : i32
    %c8_i32_58 = arith.constant 8 : i32
    %166 = arith.muli %c4_i32, %c8_i32_58 : i32
    %167 = tpu.assume_multiple %166, 8 : i32
    %168 = arith.index_cast %167 : i32 to index
    %c0_59 = arith.constant 0 : index
    %169 = vector.load %arg12[%168, %c0_59] : memref<64x128xf32, #tpu.memory_space<vmem>>, vector<8x128xf32>
    %cst_60 = arith.constant dense<0.000000e+00> : vector<8x128xf32>
    %170 = tpu.matmul %163, %2, %cst_60 {dimension_numbers = #tpu.dot_dimension_numbers<[1], [0], [0], [1], [0, 0, 1, 1], [], []>} : vector<8x32xf32>, vector<32x128xf32>, vector<8x128xf32> -> vector<8x128xf32>
    %171 = vector.extract_strided_slice %169 {offsets = [0, 0], sizes = [8, 32], strides = [1, 1]} : vector<8x128xf32> to vector<8x32xf32>
    %172 = vector.extract_strided_slice %170 {offsets = [0, 0], sizes = [8, 32], strides = [1, 1]} : vector<8x128xf32> to vector<8x32xf32>
    %173 = arith.addf %171, %172 : vector<8x32xf32>
    %cst_61 = arith.constant 5.000000e-01 : f32
    %174 = vector.broadcast %cst_61 : f32 to vector<8x32xf32>
    %175 = arith.mulf %174, %173 : vector<8x32xf32>
    %176 = math.tanh %175 : vector<8x32xf32>
    %cst_62 = arith.constant 5.000000e-01 : f32
    %177 = vector.broadcast %cst_62 : f32 to vector<8x32xf32>
    %178 = arith.mulf %177, %176 : vector<8x32xf32>
    %cst_63 = arith.constant 5.000000e-01 : f32
    %179 = vector.broadcast %cst_63 : f32 to vector<8x32xf32>
    %180 = arith.addf %178, %179 : vector<8x32xf32>
    %181 = vector.extract_strided_slice %169 {offsets = [0, 32], sizes = [8, 32], strides = [1, 1]} : vector<8x128xf32> to vector<8x32xf32>
    %182 = vector.extract_strided_slice %170 {offsets = [0, 32], sizes = [8, 32], strides = [1, 1]} : vector<8x128xf32> to vector<8x32xf32>
    %183 = arith.addf %181, %182 : vector<8x32xf32>
    %cst_64 = arith.constant 5.000000e-01 : f32
    %184 = vector.broadcast %cst_64 : f32 to vector<8x32xf32>
    %185 = arith.mulf %184, %183 : vector<8x32xf32>
    %186 = math.tanh %185 : vector<8x32xf32>
    %cst_65 = arith.constant 5.000000e-01 : f32
    %187 = vector.broadcast %cst_65 : f32 to vector<8x32xf32>
    %188 = arith.mulf %187, %186 : vector<8x32xf32>
    %cst_66 = arith.constant 5.000000e-01 : f32
    %189 = vector.broadcast %cst_66 : f32 to vector<8x32xf32>
    %190 = arith.addf %188, %189 : vector<8x32xf32>
    %191 = vector.extract_strided_slice %169 {offsets = [0, 64], sizes = [8, 32], strides = [1, 1]} : vector<8x128xf32> to vector<8x32xf32>
    %192 = vector.extract_strided_slice %170 {offsets = [0, 64], sizes = [8, 32], strides = [1, 1]} : vector<8x128xf32> to vector<8x32xf32>
    %193 = arith.addf %192, %5 : vector<8x32xf32>
    %194 = arith.mulf %180, %193 : vector<8x32xf32>
    %195 = arith.addf %191, %194 : vector<8x32xf32>
    %196 = math.tanh %195 : vector<8x32xf32>
    %cst_67 = arith.constant 1.000000e+00 : f32
    %197 = vector.broadcast %cst_67 : f32 to vector<8x32xf32>
    %198 = arith.subf %197, %190 : vector<8x32xf32>
    %199 = arith.mulf %198, %196 : vector<8x32xf32>
    %200 = arith.mulf %190, %163 : vector<8x32xf32>
    %201 = arith.addf %199, %200 : vector<8x32xf32>
    %202 = arith.index_cast %167 : i32 to index
    %c0_68 = arith.constant 0 : index
    %203 = vector.load %arg13[%202, %c0_68] : memref<64x128xf32, #tpu.memory_space<vmem>>, vector<8x32xf32>
    tpu.vector_store %arg13[%202, %c0_68], %201 {strides = array<i32>} : memref<64x128xf32, #tpu.memory_space<vmem>>, vector<8x32xf32>,
    %c5_i32 = arith.constant 5 : i32
    %c8_i32_69 = arith.constant 8 : i32
    %204 = arith.muli %c5_i32, %c8_i32_69 : i32
    %205 = tpu.assume_multiple %204, 8 : i32
    %206 = arith.index_cast %205 : i32 to index
    %c0_70 = arith.constant 0 : index
    %207 = vector.load %arg12[%206, %c0_70] : memref<64x128xf32, #tpu.memory_space<vmem>>, vector<8x128xf32>
    %cst_71 = arith.constant dense<0.000000e+00> : vector<8x128xf32>
    %208 = tpu.matmul %201, %2, %cst_71 {dimension_numbers = #tpu.dot_dimension_numbers<[1], [0], [0], [1], [0, 0, 1, 1], [], []>} : vector<8x32xf32>, vector<32x128xf32>, vector<8x128xf32> -> vector<8x128xf32>
    %209 = vector.extract_strided_slice %207 {offsets = [0, 0], sizes = [8, 32], strides = [1, 1]} : vector<8x128xf32> to vector<8x32xf32>
    %210 = vector.extract_strided_slice %208 {offsets = [0, 0], sizes = [8, 32], strides = [1, 1]} : vector<8x128xf32> to vector<8x32xf32>
    %211 = arith.addf %209, %210 : vector<8x32xf32>
    %cst_72 = arith.constant 5.000000e-01 : f32
    %212 = vector.broadcast %cst_72 : f32 to vector<8x32xf32>
    %213 = arith.mulf %212, %211 : vector<8x32xf32>
    %214 = math.tanh %213 : vector<8x32xf32>
    %cst_73 = arith.constant 5.000000e-01 : f32
    %215 = vector.broadcast %cst_73 : f32 to vector<8x32xf32>
    %216 = arith.mulf %215, %214 : vector<8x32xf32>
    %cst_74 = arith.constant 5.000000e-01 : f32
    %217 = vector.broadcast %cst_74 : f32 to vector<8x32xf32>
    %218 = arith.addf %216, %217 : vector<8x32xf32>
    %219 = vector.extract_strided_slice %207 {offsets = [0, 32], sizes = [8, 32], strides = [1, 1]} : vector<8x128xf32> to vector<8x32xf32>
    %220 = vector.extract_strided_slice %208 {offsets = [0, 32], sizes = [8, 32], strides = [1, 1]} : vector<8x128xf32> to vector<8x32xf32>
    %221 = arith.addf %219, %220 : vector<8x32xf32>
    %cst_75 = arith.constant 5.000000e-01 : f32
    %222 = vector.broadcast %cst_75 : f32 to vector<8x32xf32>
    %223 = arith.mulf %222, %221 : vector<8x32xf32>
    %224 = math.tanh %223 : vector<8x32xf32>
    %cst_76 = arith.constant 5.000000e-01 : f32
    %225 = vector.broadcast %cst_76 : f32 to vector<8x32xf32>
    %226 = arith.mulf %225, %224 : vector<8x32xf32>
    %cst_77 = arith.constant 5.000000e-01 : f32
    %227 = vector.broadcast %cst_77 : f32 to vector<8x32xf32>
    %228 = arith.addf %226, %227 : vector<8x32xf32>
    %229 = vector.extract_strided_slice %207 {offsets = [0, 64], sizes = [8, 32], strides = [1, 1]} : vector<8x128xf32> to vector<8x32xf32>
    %230 = vector.extract_strided_slice %208 {offsets = [0, 64], sizes = [8, 32], strides = [1, 1]} : vector<8x128xf32> to vector<8x32xf32>
    %231 = arith.addf %230, %5 : vector<8x32xf32>
    %232 = arith.mulf %218, %231 : vector<8x32xf32>
    %233 = arith.addf %229, %232 : vector<8x32xf32>
    %234 = math.tanh %233 : vector<8x32xf32>
    %cst_78 = arith.constant 1.000000e+00 : f32
    %235 = vector.broadcast %cst_78 : f32 to vector<8x32xf32>
    %236 = arith.subf %235, %228 : vector<8x32xf32>
    %237 = arith.mulf %236, %234 : vector<8x32xf32>
    %238 = arith.mulf %228, %201 : vector<8x32xf32>
    %239 = arith.addf %237, %238 : vector<8x32xf32>
    %240 = arith.index_cast %205 : i32 to index
    %c0_79 = arith.constant 0 : index
    %241 = vector.load %arg13[%240, %c0_79] : memref<64x128xf32, #tpu.memory_space<vmem>>, vector<8x32xf32>
    tpu.vector_store %arg13[%240, %c0_79], %239 {strides = array<i32>} : memref<64x128xf32, #tpu.memory_space<vmem>>, vector<8x32xf32>,
    %c6_i32 = arith.constant 6 : i32
    %c8_i32_80 = arith.constant 8 : i32
    %242 = arith.muli %c6_i32, %c8_i32_80 : i32
    %243 = tpu.assume_multiple %242, 8 : i32
    %244 = arith.index_cast %243 : i32 to index
    %c0_81 = arith.constant 0 : index
    %245 = vector.load %arg12[%244, %c0_81] : memref<64x128xf32, #tpu.memory_space<vmem>>, vector<8x128xf32>
    %cst_82 = arith.constant dense<0.000000e+00> : vector<8x128xf32>
    %246 = tpu.matmul %239, %2, %cst_82 {dimension_numbers = #tpu.dot_dimension_numbers<[1], [0], [0], [1], [0, 0, 1, 1], [], []>} : vector<8x32xf32>, vector<32x128xf32>, vector<8x128xf32> -> vector<8x128xf32>
    %247 = vector.extract_strided_slice %245 {offsets = [0, 0], sizes = [8, 32], strides = [1, 1]} : vector<8x128xf32> to vector<8x32xf32>
    %248 = vector.extract_strided_slice %246 {offsets = [0, 0], sizes = [8, 32], strides = [1, 1]} : vector<8x128xf32> to vector<8x32xf32>
    %249 = arith.addf %247, %248 : vector<8x32xf32>
    %cst_83 = arith.constant 5.000000e-01 : f32
    %250 = vector.broadcast %cst_83 : f32 to vector<8x32xf32>
    %251 = arith.mulf %250, %249 : vector<8x32xf32>
    %252 = math.tanh %251 : vector<8x32xf32>
    %cst_84 = arith.constant 5.000000e-01 : f32
    %253 = vector.broadcast %cst_84 : f32 to vector<8x32xf32>
    %254 = arith.mulf %253, %252 : vector<8x32xf32>
    %cst_85 = arith.constant 5.000000e-01 : f32
    %255 = vector.broadcast %cst_85 : f32 to vector<8x32xf32>
    %256 = arith.addf %254, %255 : vector<8x32xf32>
    %257 = vector.extract_strided_slice %245 {offsets = [0, 32], sizes = [8, 32], strides = [1, 1]} : vector<8x128xf32> to vector<8x32xf32>
    %258 = vector.extract_strided_slice %246 {offsets = [0, 32], sizes = [8, 32], strides = [1, 1]} : vector<8x128xf32> to vector<8x32xf32>
    %259 = arith.addf %257, %258 : vector<8x32xf32>
    %cst_86 = arith.constant 5.000000e-01 : f32
    %260 = vector.broadcast %cst_86 : f32 to vector<8x32xf32>
    %261 = arith.mulf %260, %259 : vector<8x32xf32>
    %262 = math.tanh %261 : vector<8x32xf32>
    %cst_87 = arith.constant 5.000000e-01 : f32
    %263 = vector.broadcast %cst_87 : f32 to vector<8x32xf32>
    %264 = arith.mulf %263, %262 : vector<8x32xf32>
    %cst_88 = arith.constant 5.000000e-01 : f32
    %265 = vector.broadcast %cst_88 : f32 to vector<8x32xf32>
    %266 = arith.addf %264, %265 : vector<8x32xf32>
    %267 = vector.extract_strided_slice %245 {offsets = [0, 64], sizes = [8, 32], strides = [1, 1]} : vector<8x128xf32> to vector<8x32xf32>
    %268 = vector.extract_strided_slice %246 {offsets = [0, 64], sizes = [8, 32], strides = [1, 1]} : vector<8x128xf32> to vector<8x32xf32>
    %269 = arith.addf %268, %5 : vector<8x32xf32>
    %270 = arith.mulf %256, %269 : vector<8x32xf32>
    %271 = arith.addf %267, %270 : vector<8x32xf32>
    %272 = math.tanh %271 : vector<8x32xf32>
    %cst_89 = arith.constant 1.000000e+00 : f32
    %273 = vector.broadcast %cst_89 : f32 to vector<8x32xf32>
    %274 = arith.subf %273, %266 : vector<8x32xf32>
    %275 = arith.mulf %274, %272 : vector<8x32xf32>
    %276 = arith.mulf %266, %239 : vector<8x32xf32>
    %277 = arith.addf %275, %276 : vector<8x32xf32>
    %278 = arith.index_cast %243 : i32 to index
    %c0_90 = arith.constant 0 : index
    %279 = vector.load %arg13[%278, %c0_90] : memref<64x128xf32, #tpu.memory_space<vmem>>, vector<8x32xf32>
    tpu.vector_store %arg13[%278, %c0_90], %277 {strides = array<i32>} : memref<64x128xf32, #tpu.memory_space<vmem>>, vector<8x32xf32>,
    %c7_i32 = arith.constant 7 : i32
    %c8_i32_91 = arith.constant 8 : i32
    %280 = arith.muli %c7_i32, %c8_i32_91 : i32
    %281 = tpu.assume_multiple %280, 8 : i32
    %282 = arith.index_cast %281 : i32 to index
    %c0_92 = arith.constant 0 : index
    %283 = vector.load %arg12[%282, %c0_92] : memref<64x128xf32, #tpu.memory_space<vmem>>, vector<8x128xf32>
    %cst_93 = arith.constant dense<0.000000e+00> : vector<8x128xf32>
    %284 = tpu.matmul %277, %2, %cst_93 {dimension_numbers = #tpu.dot_dimension_numbers<[1], [0], [0], [1], [0, 0, 1, 1], [], []>} : vector<8x32xf32>, vector<32x128xf32>, vector<8x128xf32> -> vector<8x128xf32>
    %285 = vector.extract_strided_slice %283 {offsets = [0, 0], sizes = [8, 32], strides = [1, 1]} : vector<8x128xf32> to vector<8x32xf32>
    %286 = vector.extract_strided_slice %284 {offsets = [0, 0], sizes = [8, 32], strides = [1, 1]} : vector<8x128xf32> to vector<8x32xf32>
    %287 = arith.addf %285, %286 : vector<8x32xf32>
    %cst_94 = arith.constant 5.000000e-01 : f32
    %288 = vector.broadcast %cst_94 : f32 to vector<8x32xf32>
    %289 = arith.mulf %288, %287 : vector<8x32xf32>
    %290 = math.tanh %289 : vector<8x32xf32>
    %cst_95 = arith.constant 5.000000e-01 : f32
    %291 = vector.broadcast %cst_95 : f32 to vector<8x32xf32>
    %292 = arith.mulf %291, %290 : vector<8x32xf32>
    %cst_96 = arith.constant 5.000000e-01 : f32
    %293 = vector.broadcast %cst_96 : f32 to vector<8x32xf32>
    %294 = arith.addf %292, %293 : vector<8x32xf32>
    %295 = vector.extract_strided_slice %283 {offsets = [0, 32], sizes = [8, 32], strides = [1, 1]} : vector<8x128xf32> to vector<8x32xf32>
    %296 = vector.extract_strided_slice %284 {offsets = [0, 32], sizes = [8, 32], strides = [1, 1]} : vector<8x128xf32> to vector<8x32xf32>
    %297 = arith.addf %295, %296 : vector<8x32xf32>
    %cst_97 = arith.constant 5.000000e-01 : f32
    %298 = vector.broadcast %cst_97 : f32 to vector<8x32xf32>
    %299 = arith.mulf %298, %297 : vector<8x32xf32>
    %300 = math.tanh %299 : vector<8x32xf32>
    %cst_98 = arith.constant 5.000000e-01 : f32
    %301 = vector.broadcast %cst_98 : f32 to vector<8x32xf32>
    %302 = arith.mulf %301, %300 : vector<8x32xf32>
    %cst_99 = arith.constant 5.000000e-01 : f32
    %303 = vector.broadcast %cst_99 : f32 to vector<8x32xf32>
    %304 = arith.addf %302, %303 : vector<8x32xf32>
    %305 = vector.extract_strided_slice %283 {offsets = [0, 64], sizes = [8, 32], strides = [1, 1]} : vector<8x128xf32> to vector<8x32xf32>
    %306 = vector.extract_strided_slice %284 {offsets = [0, 64], sizes = [8, 32], strides = [1, 1]} : vector<8x128xf32> to vector<8x32xf32>
    %307 = arith.addf %306, %5 : vector<8x32xf32>
    %308 = arith.mulf %294, %307 : vector<8x32xf32>
    %309 = arith.addf %305, %308 : vector<8x32xf32>
    %310 = math.tanh %309 : vector<8x32xf32>
    %cst_100 = arith.constant 1.000000e+00 : f32
    %311 = vector.broadcast %cst_100 : f32 to vector<8x32xf32>
    %312 = arith.subf %311, %304 : vector<8x32xf32>
    %313 = arith.mulf %312, %310 : vector<8x32xf32>
    %314 = arith.mulf %304, %277 : vector<8x32xf32>
    %315 = arith.addf %313, %314 : vector<8x32xf32>
    %316 = arith.index_cast %281 : i32 to index
    %c0_101 = arith.constant 0 : index
    %317 = vector.load %arg13[%316, %c0_101] : memref<64x128xf32, #tpu.memory_space<vmem>>, vector<8x32xf32>
    tpu.vector_store %arg13[%316, %c0_101], %315 {strides = array<i32>} : memref<64x128xf32, #tpu.memory_space<vmem>>, vector<8x32xf32>,
    %c8_i32_102 = arith.constant 8 : i32
    %c0_103 = arith.constant 0 : index
    %c0_104 = arith.constant 0 : index
    %318 = vector.load %arg6[%c0_103, %c0_104] : memref<32x128xf32, #tpu.memory_space<vmem>>, vector<32x128xf32>
    %c0_105 = arith.constant 0 : index
    %c0_106 = arith.constant 0 : index
    %319 = vector.load %arg8[%c0_105, %c0_106] : memref<1x32xf32, #tpu.memory_space<vmem>>, vector<1x32xf32>
    %320 = vector.shape_cast %319 : vector<1x32xf32> to vector<1x32xf32>
    %321 = vector.broadcast %320 : vector<1x32xf32> to vector<8x32xf32>
    %c0_107 = arith.constant 0 : index
    %c0_108 = arith.constant 0 : index
    %322 = vector.load %arg13[%c0_107, %c0_108] : memref<64x128xf32, #tpu.memory_space<vmem>>, vector<64x128xf32>
    %c0_109 = arith.constant 0 : index
    %c0_110 = arith.constant 0 : index
    %323 = vector.load %arg5[%c0_109, %c0_110] : memref<128x128xf32, #tpu.memory_space<vmem>>, vector<128x128xf32>
    %cst_111 = arith.constant dense<0.000000e+00> : vector<64x128xf32>
    %324 = tpu.matmul %322, %323, %cst_111 {dimension_numbers = #tpu.dot_dimension_numbers<[1], [0], [0], [1], [0, 0, 1, 1], [], []>} : vector<64x128xf32>, vector<128x128xf32>, vector<64x128xf32> -> vector<64x128xf32>
    %c0_112 = arith.constant 0 : index
    %c0_113 = arith.constant 0 : index
    %325 = vector.load %arg7[%c0_112, %c0_113] : memref<1x128xf32, #tpu.memory_space<vmem>>, vector<1x128xf32>
    %326 = vector.broadcast %325 : vector<1x128xf32> to vector<64x128xf32>
    %327 = arith.addf %324, %326 : vector<64x128xf32>
    %c0_114 = arith.constant 0 : index
    %c0_115 = arith.constant 0 : index
    %328 = vector.load %arg12[%c0_114, %c0_115] : memref<64x128xf32, #tpu.memory_space<vmem>>, vector<64x128xf32>
    tpu.vector_store %arg12[%c0_114, %c0_115], %327 {strides = array<i32>} : memref<64x128xf32, #tpu.memory_space<vmem>>, vector<64x128xf32>,
    %cst_116 = arith.constant 0.000000e+00 : f32
    %329 = vector.broadcast %cst_116 : f32 to vector<8x32xf32>
    %c0_i32_117 = arith.constant 0 : i32
    %c8_i32_118 = arith.constant 8 : i32
    %330 = arith.muli %c0_i32_117, %c8_i32_118 : i32
    %331 = tpu.assume_multiple %330, 8 : i32
    %332 = arith.index_cast %331 : i32 to index
    %c0_119 = arith.constant 0 : index
    %333 = vector.load %arg12[%332, %c0_119] : memref<64x128xf32, #tpu.memory_space<vmem>>, vector<8x128xf32>
    %cst_120 = arith.constant dense<0.000000e+00> : vector<8x128xf32>
    %334 = tpu.matmul %329, %318, %cst_120 {dimension_numbers = #tpu.dot_dimension_numbers<[1], [0], [0], [1], [0, 0, 1, 1], [], []>} : vector<8x32xf32>, vector<32x128xf32>, vector<8x128xf32> -> vector<8x128xf32>
    %335 = vector.extract_strided_slice %333 {offsets = [0, 0], sizes = [8, 32], strides = [1, 1]} : vector<8x128xf32> to vector<8x32xf32>
    %336 = vector.extract_strided_slice %334 {offsets = [0, 0], sizes = [8, 32], strides = [1, 1]} : vector<8x128xf32> to vector<8x32xf32>
    %337 = arith.addf %335, %336 : vector<8x32xf32>
    %cst_121 = arith.constant 5.000000e-01 : f32
    %338 = vector.broadcast %cst_121 : f32 to vector<8x32xf32>
    %339 = arith.mulf %338, %337 : vector<8x32xf32>
    %340 = math.tanh %339 : vector<8x32xf32>
    %cst_122 = arith.constant 5.000000e-01 : f32
    %341 = vector.broadcast %cst_122 : f32 to vector<8x32xf32>
    %342 = arith.mulf %341, %340 : vector<8x32xf32>
    %cst_123 = arith.constant 5.000000e-01 : f32
    %343 = vector.broadcast %cst_123 : f32 to vector<8x32xf32>
    %344 = arith.addf %342, %343 : vector<8x32xf32>
    %345 = vector.extract_strided_slice %333 {offsets = [0, 32], sizes = [8, 32], strides = [1, 1]} : vector<8x128xf32> to vector<8x32xf32>
    %346 = vector.extract_strided_slice %334 {offsets = [0, 32], sizes = [8, 32], strides = [1, 1]} : vector<8x128xf32> to vector<8x32xf32>
    %347 = arith.addf %345, %346 : vector<8x32xf32>
    %cst_124 = arith.constant 5.000000e-01 : f32
    %348 = vector.broadcast %cst_124 : f32 to vector<8x32xf32>
    %349 = arith.mulf %348, %347 : vector<8x32xf32>
    %350 = math.tanh %349 : vector<8x32xf32>
    %cst_125 = arith.constant 5.000000e-01 : f32
    %351 = vector.broadcast %cst_125 : f32 to vector<8x32xf32>
    %352 = arith.mulf %351, %350 : vector<8x32xf32>
    %cst_126 = arith.constant 5.000000e-01 : f32
    %353 = vector.broadcast %cst_126 : f32 to vector<8x32xf32>
    %354 = arith.addf %352, %353 : vector<8x32xf32>
    %355 = vector.extract_strided_slice %333 {offsets = [0, 64], sizes = [8, 32], strides = [1, 1]} : vector<8x128xf32> to vector<8x32xf32>
    %356 = vector.extract_strided_slice %334 {offsets = [0, 64], sizes = [8, 32], strides = [1, 1]} : vector<8x128xf32> to vector<8x32xf32>
    %357 = arith.addf %356, %321 : vector<8x32xf32>
    %358 = arith.mulf %344, %357 : vector<8x32xf32>
    %359 = arith.addf %355, %358 : vector<8x32xf32>
    %360 = math.tanh %359 : vector<8x32xf32>
    %cst_127 = arith.constant 1.000000e+00 : f32
    %361 = vector.broadcast %cst_127 : f32 to vector<8x32xf32>
    %362 = arith.subf %361, %354 : vector<8x32xf32>
    %363 = arith.mulf %362, %360 : vector<8x32xf32>
    %364 = arith.mulf %354, %329 : vector<8x32xf32>
    %365 = arith.addf %363, %364 : vector<8x32xf32>
    %c1_i32_128 = arith.constant 1 : i32
    %c8_i32_129 = arith.constant 8 : i32
    %366 = arith.muli %c1_i32_128, %c8_i32_129 : i32
    %367 = tpu.assume_multiple %366, 8 : i32
    %368 = arith.index_cast %367 : i32 to index
    %c0_130 = arith.constant 0 : index
    %369 = vector.load %arg12[%368, %c0_130] : memref<64x128xf32, #tpu.memory_space<vmem>>, vector<8x128xf32>
    %cst_131 = arith.constant dense<0.000000e+00> : vector<8x128xf32>
    %370 = tpu.matmul %365, %318, %cst_131 {dimension_numbers = #tpu.dot_dimension_numbers<[1], [0], [0], [1], [0, 0, 1, 1], [], []>} : vector<8x32xf32>, vector<32x128xf32>, vector<8x128xf32> -> vector<8x128xf32>
    %371 = vector.extract_strided_slice %369 {offsets = [0, 0], sizes = [8, 32], strides = [1, 1]} : vector<8x128xf32> to vector<8x32xf32>
    %372 = vector.extract_strided_slice %370 {offsets = [0, 0], sizes = [8, 32], strides = [1, 1]} : vector<8x128xf32> to vector<8x32xf32>
    %373 = arith.addf %371, %372 : vector<8x32xf32>
    %cst_132 = arith.constant 5.000000e-01 : f32
    %374 = vector.broadcast %cst_132 : f32 to vector<8x32xf32>
    %375 = arith.mulf %374, %373 : vector<8x32xf32>
    %376 = math.tanh %375 : vector<8x32xf32>
    %cst_133 = arith.constant 5.000000e-01 : f32
    %377 = vector.broadcast %cst_133 : f32 to vector<8x32xf32>
    %378 = arith.mulf %377, %376 : vector<8x32xf32>
    %cst_134 = arith.constant 5.000000e-01 : f32
    %379 = vector.broadcast %cst_134 : f32 to vector<8x32xf32>
    %380 = arith.addf %378, %379 : vector<8x32xf32>
    %381 = vector.extract_strided_slice %369 {offsets = [0, 32], sizes = [8, 32], strides = [1, 1]} : vector<8x128xf32> to vector<8x32xf32>
    %382 = vector.extract_strided_slice %370 {offsets = [0, 32], sizes = [8, 32], strides = [1, 1]} : vector<8x128xf32> to vector<8x32xf32>
    %383 = arith.addf %381, %382 : vector<8x32xf32>
    %cst_135 = arith.constant 5.000000e-01 : f32
    %384 = vector.broadcast %cst_135 : f32 to vector<8x32xf32>
    %385 = arith.mulf %384, %383 : vector<8x32xf32>
    %386 = math.tanh %385 : vector<8x32xf32>
    %cst_136 = arith.constant 5.000000e-01 : f32
    %387 = vector.broadcast %cst_136 : f32 to vector<8x32xf32>
    %388 = arith.mulf %387, %386 : vector<8x32xf32>
    %cst_137 = arith.constant 5.000000e-01 : f32
    %389 = vector.broadcast %cst_137 : f32 to vector<8x32xf32>
    %390 = arith.addf %388, %389 : vector<8x32xf32>
    %391 = vector.extract_strided_slice %369 {offsets = [0, 64], sizes = [8, 32], strides = [1, 1]} : vector<8x128xf32> to vector<8x32xf32>
    %392 = vector.extract_strided_slice %370 {offsets = [0, 64], sizes = [8, 32], strides = [1, 1]} : vector<8x128xf32> to vector<8x32xf32>
    %393 = arith.addf %392, %321 : vector<8x32xf32>
    %394 = arith.mulf %380, %393 : vector<8x32xf32>
    %395 = arith.addf %391, %394 : vector<8x32xf32>
    %396 = math.tanh %395 : vector<8x32xf32>
    %cst_138 = arith.constant 1.000000e+00 : f32
    %397 = vector.broadcast %cst_138 : f32 to vector<8x32xf32>
    %398 = arith.subf %397, %390 : vector<8x32xf32>
    %399 = arith.mulf %398, %396 : vector<8x32xf32>
    %400 = arith.mulf %390, %365 : vector<8x32xf32>
    %401 = arith.addf %399, %400 : vector<8x32xf32>
    %c2_i32_139 = arith.constant 2 : i32
    %c8_i32_140 = arith.constant 8 : i32
    %402 = arith.muli %c2_i32_139, %c8_i32_140 : i32
    %403 = tpu.assume_multiple %402, 8 : i32
    %404 = arith.index_cast %403 : i32 to index
    %c0_141 = arith.constant 0 : index
    %405 = vector.load %arg12[%404, %c0_141] : memref<64x128xf32, #tpu.memory_space<vmem>>, vector<8x128xf32>
    %cst_142 = arith.constant dense<0.000000e+00> : vector<8x128xf32>
    %406 = tpu.matmul %401, %318, %cst_142 {dimension_numbers = #tpu.dot_dimension_numbers<[1], [0], [0], [1], [0, 0, 1, 1], [], []>} : vector<8x32xf32>, vector<32x128xf32>, vector<8x128xf32> -> vector<8x128xf32>
    %407 = vector.extract_strided_slice %405 {offsets = [0, 0], sizes = [8, 32], strides = [1, 1]} : vector<8x128xf32> to vector<8x32xf32>
    %408 = vector.extract_strided_slice %406 {offsets = [0, 0], sizes = [8, 32], strides = [1, 1]} : vector<8x128xf32> to vector<8x32xf32>
    %409 = arith.addf %407, %408 : vector<8x32xf32>
    %cst_143 = arith.constant 5.000000e-01 : f32
    %410 = vector.broadcast %cst_143 : f32 to vector<8x32xf32>
    %411 = arith.mulf %410, %409 : vector<8x32xf32>
    %412 = math.tanh %411 : vector<8x32xf32>
    %cst_144 = arith.constant 5.000000e-01 : f32
    %413 = vector.broadcast %cst_144 : f32 to vector<8x32xf32>
    %414 = arith.mulf %413, %412 : vector<8x32xf32>
    %cst_145 = arith.constant 5.000000e-01 : f32
    %415 = vector.broadcast %cst_145 : f32 to vector<8x32xf32>
    %416 = arith.addf %414, %415 : vector<8x32xf32>
    %417 = vector.extract_strided_slice %405 {offsets = [0, 32], sizes = [8, 32], strides = [1, 1]} : vector<8x128xf32> to vector<8x32xf32>
    %418 = vector.extract_strided_slice %406 {offsets = [0, 32], sizes = [8, 32], strides = [1, 1]} : vector<8x128xf32> to vector<8x32xf32>
    %419 = arith.addf %417, %418 : vector<8x32xf32>
    %cst_146 = arith.constant 5.000000e-01 : f32
    %420 = vector.broadcast %cst_146 : f32 to vector<8x32xf32>
    %421 = arith.mulf %420, %419 : vector<8x32xf32>
    %422 = math.tanh %421 : vector<8x32xf32>
    %cst_147 = arith.constant 5.000000e-01 : f32
    %423 = vector.broadcast %cst_147 : f32 to vector<8x32xf32>
    %424 = arith.mulf %423, %422 : vector<8x32xf32>
    %cst_148 = arith.constant 5.000000e-01 : f32
    %425 = vector.broadcast %cst_148 : f32 to vector<8x32xf32>
    %426 = arith.addf %424, %425 : vector<8x32xf32>
    %427 = vector.extract_strided_slice %405 {offsets = [0, 64], sizes = [8, 32], strides = [1, 1]} : vector<8x128xf32> to vector<8x32xf32>
    %428 = vector.extract_strided_slice %406 {offsets = [0, 64], sizes = [8, 32], strides = [1, 1]} : vector<8x128xf32> to vector<8x32xf32>
    %429 = arith.addf %428, %321 : vector<8x32xf32>
    %430 = arith.mulf %416, %429 : vector<8x32xf32>
    %431 = arith.addf %427, %430 : vector<8x32xf32>
    %432 = math.tanh %431 : vector<8x32xf32>
    %cst_149 = arith.constant 1.000000e+00 : f32
    %433 = vector.broadcast %cst_149 : f32 to vector<8x32xf32>
    %434 = arith.subf %433, %426 : vector<8x32xf32>
    %435 = arith.mulf %434, %432 : vector<8x32xf32>
    %436 = arith.mulf %426, %401 : vector<8x32xf32>
    %437 = arith.addf %435, %436 : vector<8x32xf32>
    %c3_i32_150 = arith.constant 3 : i32
    %c8_i32_151 = arith.constant 8 : i32
    %438 = arith.muli %c3_i32_150, %c8_i32_151 : i32
    %439 = tpu.assume_multiple %438, 8 : i32
    %440 = arith.index_cast %439 : i32 to index
    %c0_152 = arith.constant 0 : index
    %441 = vector.load %arg12[%440, %c0_152] : memref<64x128xf32, #tpu.memory_space<vmem>>, vector<8x128xf32>
    %cst_153 = arith.constant dense<0.000000e+00> : vector<8x128xf32>
    %442 = tpu.matmul %437, %318, %cst_153 {dimension_numbers = #tpu.dot_dimension_numbers<[1], [0], [0], [1], [0, 0, 1, 1], [], []>} : vector<8x32xf32>, vector<32x128xf32>, vector<8x128xf32> -> vector<8x128xf32>
    %443 = vector.extract_strided_slice %441 {offsets = [0, 0], sizes = [8, 32], strides = [1, 1]} : vector<8x128xf32> to vector<8x32xf32>
    %444 = vector.extract_strided_slice %442 {offsets = [0, 0], sizes = [8, 32], strides = [1, 1]} : vector<8x128xf32> to vector<8x32xf32>
    %445 = arith.addf %443, %444 : vector<8x32xf32>
    %cst_154 = arith.constant 5.000000e-01 : f32
    %446 = vector.broadcast %cst_154 : f32 to vector<8x32xf32>
    %447 = arith.mulf %446, %445 : vector<8x32xf32>
    %448 = math.tanh %447 : vector<8x32xf32>
    %cst_155 = arith.constant 5.000000e-01 : f32
    %449 = vector.broadcast %cst_155 : f32 to vector<8x32xf32>
    %450 = arith.mulf %449, %448 : vector<8x32xf32>
    %cst_156 = arith.constant 5.000000e-01 : f32
    %451 = vector.broadcast %cst_156 : f32 to vector<8x32xf32>
    %452 = arith.addf %450, %451 : vector<8x32xf32>
    %453 = vector.extract_strided_slice %441 {offsets = [0, 32], sizes = [8, 32], strides = [1, 1]} : vector<8x128xf32> to vector<8x32xf32>
    %454 = vector.extract_strided_slice %442 {offsets = [0, 32], sizes = [8, 32], strides = [1, 1]} : vector<8x128xf32> to vector<8x32xf32>
    %455 = arith.addf %453, %454 : vector<8x32xf32>
    %cst_157 = arith.constant 5.000000e-01 : f32
    %456 = vector.broadcast %cst_157 : f32 to vector<8x32xf32>
    %457 = arith.mulf %456, %455 : vector<8x32xf32>
    %458 = math.tanh %457 : vector<8x32xf32>
    %cst_158 = arith.constant 5.000000e-01 : f32
    %459 = vector.broadcast %cst_158 : f32 to vector<8x32xf32>
    %460 = arith.mulf %459, %458 : vector<8x32xf32>
    %cst_159 = arith.constant 5.000000e-01 : f32
    %461 = vector.broadcast %cst_159 : f32 to vector<8x32xf32>
    %462 = arith.addf %460, %461 : vector<8x32xf32>
    %463 = vector.extract_strided_slice %441 {offsets = [0, 64], sizes = [8, 32], strides = [1, 1]} : vector<8x128xf32> to vector<8x32xf32>
    %464 = vector.extract_strided_slice %442 {offsets = [0, 64], sizes = [8, 32], strides = [1, 1]} : vector<8x128xf32> to vector<8x32xf32>
    %465 = arith.addf %464, %321 : vector<8x32xf32>
    %466 = arith.mulf %452, %465 : vector<8x32xf32>
    %467 = arith.addf %463, %466 : vector<8x32xf32>
    %468 = math.tanh %467 : vector<8x32xf32>
    %cst_160 = arith.constant 1.000000e+00 : f32
    %469 = vector.broadcast %cst_160 : f32 to vector<8x32xf32>
    %470 = arith.subf %469, %462 : vector<8x32xf32>
    %471 = arith.mulf %470, %468 : vector<8x32xf32>
    %472 = arith.mulf %462, %437 : vector<8x32xf32>
    %473 = arith.addf %471, %472 : vector<8x32xf32>
    %c4_i32_161 = arith.constant 4 : i32
    %c8_i32_162 = arith.constant 8 : i32
    %474 = arith.muli %c4_i32_161, %c8_i32_162 : i32
    %475 = tpu.assume_multiple %474, 8 : i32
    %476 = arith.index_cast %475 : i32 to index
    %c0_163 = arith.constant 0 : index
    %477 = vector.load %arg12[%476, %c0_163] : memref<64x128xf32, #tpu.memory_space<vmem>>, vector<8x128xf32>
    %cst_164 = arith.constant dense<0.000000e+00> : vector<8x128xf32>
    %478 = tpu.matmul %473, %318, %cst_164 {dimension_numbers = #tpu.dot_dimension_numbers<[1], [0], [0], [1], [0, 0, 1, 1], [], []>} : vector<8x32xf32>, vector<32x128xf32>, vector<8x128xf32> -> vector<8x128xf32>
    %479 = vector.extract_strided_slice %477 {offsets = [0, 0], sizes = [8, 32], strides = [1, 1]} : vector<8x128xf32> to vector<8x32xf32>
    %480 = vector.extract_strided_slice %478 {offsets = [0, 0], sizes = [8, 32], strides = [1, 1]} : vector<8x128xf32> to vector<8x32xf32>
    %481 = arith.addf %479, %480 : vector<8x32xf32>
    %cst_165 = arith.constant 5.000000e-01 : f32
    %482 = vector.broadcast %cst_165 : f32 to vector<8x32xf32>
    %483 = arith.mulf %482, %481 : vector<8x32xf32>
    %484 = math.tanh %483 : vector<8x32xf32>
    %cst_166 = arith.constant 5.000000e-01 : f32
    %485 = vector.broadcast %cst_166 : f32 to vector<8x32xf32>
    %486 = arith.mulf %485, %484 : vector<8x32xf32>
    %cst_167 = arith.constant 5.000000e-01 : f32
    %487 = vector.broadcast %cst_167 : f32 to vector<8x32xf32>
    %488 = arith.addf %486, %487 : vector<8x32xf32>
    %489 = vector.extract_strided_slice %477 {offsets = [0, 32], sizes = [8, 32], strides = [1, 1]} : vector<8x128xf32> to vector<8x32xf32>
    %490 = vector.extract_strided_slice %478 {offsets = [0, 32], sizes = [8, 32], strides = [1, 1]} : vector<8x128xf32> to vector<8x32xf32>
    %491 = arith.addf %489, %490 : vector<8x32xf32>
    %cst_168 = arith.constant 5.000000e-01 : f32
    %492 = vector.broadcast %cst_168 : f32 to vector<8x32xf32>
    %493 = arith.mulf %492, %491 : vector<8x32xf32>
    %494 = math.tanh %493 : vector<8x32xf32>
    %cst_169 = arith.constant 5.000000e-01 : f32
    %495 = vector.broadcast %cst_169 : f32 to vector<8x32xf32>
    %496 = arith.mulf %495, %494 : vector<8x32xf32>
    %cst_170 = arith.constant 5.000000e-01 : f32
    %497 = vector.broadcast %cst_170 : f32 to vector<8x32xf32>
    %498 = arith.addf %496, %497 : vector<8x32xf32>
    %499 = vector.extract_strided_slice %477 {offsets = [0, 64], sizes = [8, 32], strides = [1, 1]} : vector<8x128xf32> to vector<8x32xf32>
    %500 = vector.extract_strided_slice %478 {offsets = [0, 64], sizes = [8, 32], strides = [1, 1]} : vector<8x128xf32> to vector<8x32xf32>
    %501 = arith.addf %500, %321 : vector<8x32xf32>
    %502 = arith.mulf %488, %501 : vector<8x32xf32>
    %503 = arith.addf %499, %502 : vector<8x32xf32>
    %504 = math.tanh %503 : vector<8x32xf32>
    %cst_171 = arith.constant 1.000000e+00 : f32
    %505 = vector.broadcast %cst_171 : f32 to vector<8x32xf32>
    %506 = arith.subf %505, %498 : vector<8x32xf32>
    %507 = arith.mulf %506, %504 : vector<8x32xf32>
    %508 = arith.mulf %498, %473 : vector<8x32xf32>
    %509 = arith.addf %507, %508 : vector<8x32xf32>
    %c5_i32_172 = arith.constant 5 : i32
    %c8_i32_173 = arith.constant 8 : i32
    %510 = arith.muli %c5_i32_172, %c8_i32_173 : i32
    %511 = tpu.assume_multiple %510, 8 : i32
    %512 = arith.index_cast %511 : i32 to index
    %c0_174 = arith.constant 0 : index
    %513 = vector.load %arg12[%512, %c0_174] : memref<64x128xf32, #tpu.memory_space<vmem>>, vector<8x128xf32>
    %cst_175 = arith.constant dense<0.000000e+00> : vector<8x128xf32>
    %514 = tpu.matmul %509, %318, %cst_175 {dimension_numbers = #tpu.dot_dimension_numbers<[1], [0], [0], [1], [0, 0, 1, 1], [], []>} : vector<8x32xf32>, vector<32x128xf32>, vector<8x128xf32> -> vector<8x128xf32>
    %515 = vector.extract_strided_slice %513 {offsets = [0, 0], sizes = [8, 32], strides = [1, 1]} : vector<8x128xf32> to vector<8x32xf32>
    %516 = vector.extract_strided_slice %514 {offsets = [0, 0], sizes = [8, 32], strides = [1, 1]} : vector<8x128xf32> to vector<8x32xf32>
    %517 = arith.addf %515, %516 : vector<8x32xf32>
    %cst_176 = arith.constant 5.000000e-01 : f32
    %518 = vector.broadcast %cst_176 : f32 to vector<8x32xf32>
    %519 = arith.mulf %518, %517 : vector<8x32xf32>
    %520 = math.tanh %519 : vector<8x32xf32>
    %cst_177 = arith.constant 5.000000e-01 : f32
    %521 = vector.broadcast %cst_177 : f32 to vector<8x32xf32>
    %522 = arith.mulf %521, %520 : vector<8x32xf32>
    %cst_178 = arith.constant 5.000000e-01 : f32
    %523 = vector.broadcast %cst_178 : f32 to vector<8x32xf32>
    %524 = arith.addf %522, %523 : vector<8x32xf32>
    %525 = vector.extract_strided_slice %513 {offsets = [0, 32], sizes = [8, 32], strides = [1, 1]} : vector<8x128xf32> to vector<8x32xf32>
    %526 = vector.extract_strided_slice %514 {offsets = [0, 32], sizes = [8, 32], strides = [1, 1]} : vector<8x128xf32> to vector<8x32xf32>
    %527 = arith.addf %525, %526 : vector<8x32xf32>
    %cst_179 = arith.constant 5.000000e-01 : f32
    %528 = vector.broadcast %cst_179 : f32 to vector<8x32xf32>
    %529 = arith.mulf %528, %527 : vector<8x32xf32>
    %530 = math.tanh %529 : vector<8x32xf32>
    %cst_180 = arith.constant 5.000000e-01 : f32
    %531 = vector.broadcast %cst_180 : f32 to vector<8x32xf32>
    %532 = arith.mulf %531, %530 : vector<8x32xf32>
    %cst_181 = arith.constant 5.000000e-01 : f32
    %533 = vector.broadcast %cst_181 : f32 to vector<8x32xf32>
    %534 = arith.addf %532, %533 : vector<8x32xf32>
    %535 = vector.extract_strided_slice %513 {offsets = [0, 64], sizes = [8, 32], strides = [1, 1]} : vector<8x128xf32> to vector<8x32xf32>
    %536 = vector.extract_strided_slice %514 {offsets = [0, 64], sizes = [8, 32], strides = [1, 1]} : vector<8x128xf32> to vector<8x32xf32>
    %537 = arith.addf %536, %321 : vector<8x32xf32>
    %538 = arith.mulf %524, %537 : vector<8x32xf32>
    %539 = arith.addf %535, %538 : vector<8x32xf32>
    %540 = math.tanh %539 : vector<8x32xf32>
    %cst_182 = arith.constant 1.000000e+00 : f32
    %541 = vector.broadcast %cst_182 : f32 to vector<8x32xf32>
    %542 = arith.subf %541, %534 : vector<8x32xf32>
    %543 = arith.mulf %542, %540 : vector<8x32xf32>
    %544 = arith.mulf %534, %509 : vector<8x32xf32>
    %545 = arith.addf %543, %544 : vector<8x32xf32>
    %c6_i32_183 = arith.constant 6 : i32
    %c8_i32_184 = arith.constant 8 : i32
    %546 = arith.muli %c6_i32_183, %c8_i32_184 : i32
    %547 = tpu.assume_multiple %546, 8 : i32
    %548 = arith.index_cast %547 : i32 to index
    %c0_185 = arith.constant 0 : index
    %549 = vector.load %arg12[%548, %c0_185] : memref<64x128xf32, #tpu.memory_space<vmem>>, vector<8x128xf32>
    %cst_186 = arith.constant dense<0.000000e+00> : vector<8x128xf32>
    %550 = tpu.matmul %545, %318, %cst_186 {dimension_numbers = #tpu.dot_dimension_numbers<[1], [0], [0], [1], [0, 0, 1, 1], [], []>} : vector<8x32xf32>, vector<32x128xf32>, vector<8x128xf32> -> vector<8x128xf32>
    %551 = vector.extract_strided_slice %549 {offsets = [0, 0], sizes = [8, 32], strides = [1, 1]} : vector<8x128xf32> to vector<8x32xf32>
    %552 = vector.extract_strided_slice %550 {offsets = [0, 0], sizes = [8, 32], strides = [1, 1]} : vector<8x128xf32> to vector<8x32xf32>
    %553 = arith.addf %551, %552 : vector<8x32xf32>
    %cst_187 = arith.constant 5.000000e-01 : f32
    %554 = vector.broadcast %cst_187 : f32 to vector<8x32xf32>
    %555 = arith.mulf %554, %553 : vector<8x32xf32>
    %556 = math.tanh %555 : vector<8x32xf32>
    %cst_188 = arith.constant 5.000000e-01 : f32
    %557 = vector.broadcast %cst_188 : f32 to vector<8x32xf32>
    %558 = arith.mulf %557, %556 : vector<8x32xf32>
    %cst_189 = arith.constant 5.000000e-01 : f32
    %559 = vector.broadcast %cst_189 : f32 to vector<8x32xf32>
    %560 = arith.addf %558, %559 : vector<8x32xf32>
    %561 = vector.extract_strided_slice %549 {offsets = [0, 32], sizes = [8, 32], strides = [1, 1]} : vector<8x128xf32> to vector<8x32xf32>
    %562 = vector.extract_strided_slice %550 {offsets = [0, 32], sizes = [8, 32], strides = [1, 1]} : vector<8x128xf32> to vector<8x32xf32>
    %563 = arith.addf %561, %562 : vector<8x32xf32>
    %cst_190 = arith.constant 5.000000e-01 : f32
    %564 = vector.broadcast %cst_190 : f32 to vector<8x32xf32>
    %565 = arith.mulf %564, %563 : vector<8x32xf32>
    %566 = math.tanh %565 : vector<8x32xf32>
    %cst_191 = arith.constant 5.000000e-01 : f32
    %567 = vector.broadcast %cst_191 : f32 to vector<8x32xf32>
    %568 = arith.mulf %567, %566 : vector<8x32xf32>
    %cst_192 = arith.constant 5.000000e-01 : f32
    %569 = vector.broadcast %cst_192 : f32 to vector<8x32xf32>
    %570 = arith.addf %568, %569 : vector<8x32xf32>
    %571 = vector.extract_strided_slice %549 {offsets = [0, 64], sizes = [8, 32], strides = [1, 1]} : vector<8x128xf32> to vector<8x32xf32>
    %572 = vector.extract_strided_slice %550 {offsets = [0, 64], sizes = [8, 32], strides = [1, 1]} : vector<8x128xf32> to vector<8x32xf32>
    %573 = arith.addf %572, %321 : vector<8x32xf32>
    %574 = arith.mulf %560, %573 : vector<8x32xf32>
    %575 = arith.addf %571, %574 : vector<8x32xf32>
    %576 = math.tanh %575 : vector<8x32xf32>
    %cst_193 = arith.constant 1.000000e+00 : f32
    %577 = vector.broadcast %cst_193 : f32 to vector<8x32xf32>
    %578 = arith.subf %577, %570 : vector<8x32xf32>
    %579 = arith.mulf %578, %576 : vector<8x32xf32>
    %580 = arith.mulf %570, %545 : vector<8x32xf32>
    %581 = arith.addf %579, %580 : vector<8x32xf32>
    %c7_i32_194 = arith.constant 7 : i32
    %c8_i32_195 = arith.constant 8 : i32
    %582 = arith.muli %c7_i32_194, %c8_i32_195 : i32
    %583 = tpu.assume_multiple %582, 8 : i32
    %584 = arith.index_cast %583 : i32 to index
    %c0_196 = arith.constant 0 : index
    %585 = vector.load %arg12[%584, %c0_196] : memref<64x128xf32, #tpu.memory_space<vmem>>, vector<8x128xf32>
    %cst_197 = arith.constant dense<0.000000e+00> : vector<8x128xf32>
    %586 = tpu.matmul %581, %318, %cst_197 {dimension_numbers = #tpu.dot_dimension_numbers<[1], [0], [0], [1], [0, 0, 1, 1], [], []>} : vector<8x32xf32>, vector<32x128xf32>, vector<8x128xf32> -> vector<8x128xf32>
    %587 = vector.extract_strided_slice %585 {offsets = [0, 0], sizes = [8, 32], strides = [1, 1]} : vector<8x128xf32> to vector<8x32xf32>
    %588 = vector.extract_strided_slice %586 {offsets = [0, 0], sizes = [8, 32], strides = [1, 1]} : vector<8x128xf32> to vector<8x32xf32>
    %589 = arith.addf %587, %588 : vector<8x32xf32>
    %cst_198 = arith.constant 5.000000e-01 : f32
    %590 = vector.broadcast %cst_198 : f32 to vector<8x32xf32>
    %591 = arith.mulf %590, %589 : vector<8x32xf32>
    %592 = math.tanh %591 : vector<8x32xf32>
    %cst_199 = arith.constant 5.000000e-01 : f32
    %593 = vector.broadcast %cst_199 : f32 to vector<8x32xf32>
    %594 = arith.mulf %593, %592 : vector<8x32xf32>
    %cst_200 = arith.constant 5.000000e-01 : f32
    %595 = vector.broadcast %cst_200 : f32 to vector<8x32xf32>
    %596 = arith.addf %594, %595 : vector<8x32xf32>
    %597 = vector.extract_strided_slice %585 {offsets = [0, 32], sizes = [8, 32], strides = [1, 1]} : vector<8x128xf32> to vector<8x32xf32>
    %598 = vector.extract_strided_slice %586 {offsets = [0, 32], sizes = [8, 32], strides = [1, 1]} : vector<8x128xf32> to vector<8x32xf32>
    %599 = arith.addf %597, %598 : vector<8x32xf32>
    %cst_201 = arith.constant 5.000000e-01 : f32
    %600 = vector.broadcast %cst_201 : f32 to vector<8x32xf32>
    %601 = arith.mulf %600, %599 : vector<8x32xf32>
    %602 = math.tanh %601 : vector<8x32xf32>
    %cst_202 = arith.constant 5.000000e-01 : f32
    %603 = vector.broadcast %cst_202 : f32 to vector<8x32xf32>
    %604 = arith.mulf %603, %602 : vector<8x32xf32>
    %cst_203 = arith.constant 5.000000e-01 : f32
    %605 = vector.broadcast %cst_203 : f32 to vector<8x32xf32>
    %606 = arith.addf %604, %605 : vector<8x32xf32>
    %607 = vector.extract_strided_slice %585 {offsets = [0, 64], sizes = [8, 32], strides = [1, 1]} : vector<8x128xf32> to vector<8x32xf32>
    %608 = vector.extract_strided_slice %586 {offsets = [0, 64], sizes = [8, 32], strides = [1, 1]} : vector<8x128xf32> to vector<8x32xf32>
    %609 = arith.addf %608, %321 : vector<8x32xf32>
    %610 = arith.mulf %596, %609 : vector<8x32xf32>
    %611 = arith.addf %607, %610 : vector<8x32xf32>
    %612 = math.tanh %611 : vector<8x32xf32>
    %cst_204 = arith.constant 1.000000e+00 : f32
    %613 = vector.broadcast %cst_204 : f32 to vector<8x32xf32>
    %614 = arith.subf %613, %606 : vector<8x32xf32>
    %615 = arith.mulf %614, %612 : vector<8x32xf32>
    %616 = arith.mulf %606, %581 : vector<8x32xf32>
    %617 = arith.addf %615, %616 : vector<8x32xf32>
    %c8_i32_205 = arith.constant 8 : i32
    %c0_206 = arith.constant 0 : index
    %c0_207 = arith.constant 0 : index
    %618 = vector.load %arg9[%c0_206, %c0_207] : memref<32x128xf32, #tpu.memory_space<vmem>>, vector<32x128xf32>
    %cst_208 = arith.constant dense<0.000000e+00> : vector<8x128xf32>
    %619 = tpu.matmul %617, %618, %cst_208 {dimension_numbers = #tpu.dot_dimension_numbers<[1], [0], [0], [1], [0, 0, 1, 1], [], []>} : vector<8x32xf32>, vector<32x128xf32>, vector<8x128xf32> -> vector<8x128xf32>
    %c0_209 = arith.constant 0 : index
    %c0_210 = arith.constant 0 : index
    %620 = vector.load %arg10[%c0_209, %c0_210] : memref<1x128xf32, #tpu.memory_space<vmem>>, vector<1x128xf32>
    %621 = vector.broadcast %620 : vector<1x128xf32> to vector<8x128xf32>
    %622 = arith.addf %619, %621 : vector<8x128xf32>
    %c0_211 = arith.constant 0 : index
    %c0_212 = arith.constant 0 : index
    %623 = vector.load %arg11[%c0_211, %c0_212] : memref<8x128xf32, #tpu.memory_space<vmem>>, vector<8x128xf32>
    tpu.vector_store %arg11[%c0_211, %c0_212], %622 {strides = array<i32>} : memref<8x128xf32, #tpu.memory_space<vmem>>, vector<8x128xf32>,
    return
  }
}

</mosaic_0001>

<bundles_post_ra>
// kernel: gru_pallas_forward.1
= control target key start
LH: loop header
LB: loop body
LE: loop exit
PB: predicated region body
PF: predicated region fallthrough
CT: control target
= control target key end

     0   :  { %v2575_v0 = vmov 0.0   ;;  %vm2576_vm0 = vmmov 0   ;;  %vm75_vm1 = vcmask 261120   ;;  %s2577_s18 = smov 64   ;;  %s2578_s20 = smov 96   ;;  %s3132_s1 = inlined_call_operand.vmem [shape: f32[32,128], index: 1, kind: input, shape index: {}]   ;;  %s3133_s2 = inlined_call_operand.vmem [shape: f32[32,128], index: 2, kind: input, shape index: {}]   ;;  %s3134_s0 = inlined_call_operand.vmem [shape: f32[64,32], index: 0, kind: input, shape index: {}]   ;;  %s3135_s4 = inlined_call_operand.vmem [shape: f32[1,32], index: 4, kind: input, shape index: {}]   ;;  %s3136_s3 = inlined_call_operand.vmem [shape: f32[1,128], index: 3, kind: input, shape index: {}]   ;;  %s3137_s5 = inlined_call_operand.vmem [shape: f32[128,128], index: 5, kind: input, shape index: {}]   ;;  %s3138_s6 = inlined_call_operand.vmem [shape: f32[32,128], index: 6, kind: input, shape index: {}]   ;;  %s3139_s8 = inlined_call_operand.vmem [shape: f32[1,32], index: 8, kind: input, shape index: {}]   ;;  %s3140_s7 = inlined_call_operand.vmem [shape: f32[1,128], index: 7, kind: input, shape index: {}]   ;;  %s3141_s9 = inlined_call_operand.vmem [shape: f32[32,128], index: 9, kind: input, shape index: {}]   ;;  %s3142_s10 = inlined_call_operand.vmem [shape: f32[1,128], index: 10, kind: input, shape index: {}]   ;;  %s3143_s11 = inlined_call_operand.vmem [shape: f32[8,128], index: 11, kind: output, shape index: {}]  }
   0x1   :  { %2275 = vmatprep.subr.mxu1 %v2575_v0  ;;  %38 = vst [vmem:[#allocation3] sm:$0xff] %v2575_v0  ;;  %39 = vst [vmem:[#allocation3 + $0x8] sm:$0xff] %v2575_v0  ;;  %v67_v1 = vld [vmem:[%s3132_s1 + $0x18] sm:$0xff]  ;;  %v66_v3 = vld [vmem:[%s3132_s1 + $0x10] sm:$0xff]  ;;  %2283 = vmatprep.mubr.msk.f32.mxu1 %vm2576_vm0, %v2575_v0 }
   0x2   :  { %40 = vst [vmem:[#allocation3 + $0x10] sm:$0xff] %v2575_v0  ;;  %41 = vst [vmem:[#allocation3 + $0x18] sm:$0xff] %v2575_v0  ;;  %v2654_v2 = vld [vmem:[%s3133_s2 + $0x18] sm:$0xff]  ;;  %2255 = vmatprep.subr.mxu0 %v67_v1  ;;  %v2665_v4 = vld [vmem:[%s3133_s2 + $0x10] sm:$0xff] }
   0x3   :  { %42 = vst [vmem:[#allocation3 + $0x20] sm:$0xff] %v2575_v0  ;;  %43 = vst [vmem:[#allocation3 + $0x28] sm:$0xff] %v2575_v0  ;;  %2276 = vmatpush3.msra.mxu1 %v2654_v2  ;;  %2256 = vmatpush3.msra.mxu0 %v67_v1  ;;  %v65_v5 = vld [vmem:[%s3132_s1 + $0x8] sm:$0xff]  ;;  %v64_v7 = vld [vmem:[%s3132_s1] sm:$0xff] }
   0x4   :  { %44 = vst [vmem:[#allocation3 + $0x30] sm:$0xff] %v2575_v0  ;;  %45 = vst [vmem:[#allocation3 + $0x38] sm:$0xff] %v2575_v0  ;;  %2277 = vmatprep.subr.mxu1 %v2575_v0  ;;  %v2674_v6 = vld [vmem:[%s3133_s2 + $0x8] sm:$0xff]  ;;  %2257 = vmatprep.subr.mxu0 %v66_v3  ;;  %v2684_v8 = vld [vmem:[%s3133_s2] sm:$0xff] }
   0x5   :  { %2278 = vmatpush3.msra.mxu1 %v2665_v4  ;;  %2258 = vmatpush3.msra.mxu0 %v66_v3  ;;  %v56_v9 = vld [vmem:[%s3134_s0] sm:$0xff]  ;;  %v57_v10 = vld [vmem:[%s3134_s0 + $0x8] sm:$0xff]  ;;  %v58_v49 = vld [vmem:[%s3134_s0 + $0x10] sm:$0xff] }
   0x6   :  { %2279 = vmatprep.subr.mxu1 %v2575_v0  ;;  %2259 = vmatprep.subr.mxu0 %v65_v5  ;;  %v2106_v11 = vld [vmem:[%s3135_s4] ss:$0 sm:$0xff]  ;;  %v59_v50 = vld [vmem:[%s3134_s0 + $0x18] sm:$0xff]  ;;  %v61_v52 = vld [vmem:[%s3134_s0 + $0x28] sm:$0xff] }
   0x7   :  { %2280 = vmatpush3.msra.mxu1 %v2674_v6  ;;  %2260 = vmatpush3.msra.mxu0 %v65_v5  ;;  %v2729_v17 = vld [vmem:[%s3136_s3] ss:$0 sm:$0xff]  ;;  %v62_v53 = vld [vmem:[%s3134_s0 + $0x30] sm:$0xff]  ;;  %v63_v54 = vld [vmem:[%s3134_s0 + $0x38] sm:$0xff] }
   0x8   :  { %2281 = vmatprep.subr.mxu1 %v2575_v0  ;;  %2261 = vmatprep.subr.mxu0 %v64_v7  ;;  %v60_v51 = vld [vmem:[%s3134_s0 + $0x20] sm:$0xff] }
   0x9   :  { %2282 = vmatpush3.msra.mxu1 %v2684_v8  ;;  %2262 = vmatpush3.msra.mxu0 %v64_v7 }
   0xa   :  { %2263 = vmatprep.mubr.msk.f32.mxu0 %vm75_vm1, %v56_v9  ;;  %2284 = vmatmul.mubr.f32.vlgmr.msra.gmra.mxu1 %v2575_v0 }
   0xb   :  { %2264 = vmatmul.mubr.msk.f32.vlgmr.msra.gmra.mxu0 %vm75_vm1, %v57_v10  ;;  %292 = vrot.lane.b32.xlu0 %v2106_v11, %s2577_s18 }
   0xc   :  { %2286 = vmatprep.subr.mxu1 %v2575_v0  ;;  %2294 = vmatprep.mubr.msk.f32.mxu1 %vm2576_vm0, %v2575_v0 }
   0xd   :  { %2287 = vmatpush3.msra.mxu1 %v2654_v2  ;;  %2297 = vmatprep.subr.mxu0 %v2575_v0 }
   0xe   :  { %2288 = vmatprep.subr.mxu1 %v2575_v0  ;;  %2298 = vmatpush3.msra.mxu0 %v2654_v2 }
   0xf   :  { %2289 = vmatpush3.msra.mxu1 %v2665_v4  ;;  %2299 = vmatprep.subr.mxu0 %v2575_v0 }
  0x10   :  { %2290 = vmatprep.subr.mxu1 %v2575_v0  ;;  %2300 = vmatpush3.msra.mxu0 %v2665_v4 }
  0x11   :  { %2291 = vmatpush3.msra.mxu1 %v2674_v6  ;;  %2301 = vmatprep.subr.mxu0 %v2575_v0 }
  0x12   :  { %2292 = vmatprep.subr.mxu1 %v2575_v0  ;;  %2302 = vmatpush3.msra.mxu0 %v2674_v6 }
  0x13   :  { %2293 = vmatpush3.msra.mxu1 %v2684_v8  ;;  %2303 = vmatprep.subr.mxu0 %v2575_v0 }
  0x14   :  { %2308 = vmatprep.subr.mxu1 %v2575_v0  ;;  %2304 = vmatpush3.msra.mxu0 %v2684_v8 }
  0x15   :  { %2319 = vmatprep.subr.mxu0 %v2575_v0  ;;  %2266 = vmatprep.mubr.msk.f32.mxu0 %vm75_vm1, %v58_v49 }
  0x16   :  { %2267 = vmatmul.mubr.msk.f32.gmra.mxu0 %vm75_vm1, %v59_v50 }
  0x17   :  { %2269 = vmatprep.mubr.msk.f32.mxu0 %vm75_vm1, %v60_v51 }
  0x1a   :  { %2270 = vmatmul.mubr.msk.f32.gmra.mxu0 %vm75_vm1, %v61_v52 }
  0x1b   :  { %2272 = vmatprep.mubr.msk.f32.mxu0 %vm75_vm1, %v62_v53 }
  0x1e   :  { %2273 = vmatmul.mubr.msk.f32.gmra.mxu0 %vm75_vm1, %v63_v54 }
  0x1f   :  { %2305 = vmatprep.mubr.msk.f32.mxu0 %vm2576_vm0, %v2575_v0 }
  0x7d   :  { %v2722_v12 = vpop.permute.xlu0 %292 }
  0xca   :  { %v283_v13 = vpop.f32.mrf.mxu1 }
  0xcb   :  { %v295_v14 = vadd.f32 %v2722_v12, %v283_v13  ;;  %v2265_v16 = vpop.f32.mrf.mxu0 }
  0xcc   :  { %v2285_v15 = vpop.f32.mrf.mxu1  ;;  %v172_v39 = vadd.f32 %v2265_v16, %v2729_v17 }
  0xcd   :  { %297 = vrot.lane.b32.xlu0 %v295_v14, %s2577_s18  ;;  %v166_v18 = vpop.f32.mrf.mxu0 }
  0xce   :  { %v167_v19 = vadd.f32 %v2729_v17, %v166_v18 }
  0xd0   :  { %v287_v20 = vadd.f32 %v283_v13, %v167_v19 }
  0xd2   :  { %v288_v21 = vmul.f32 0.5, %v287_v20 }
  0xd4   :  { %2510 = vtanh.f32 %v288_v21 }
  0xd6   :  { %v2268_v62 = vpop.f32.mrf.mxu0 }
  0xd8   :  { %v176_v63 = vpop.f32.mrf.mxu0 }
  0xd9   :  { %v177_v13 = vadd.f32 %v2729_v17, %v176_v63 }
  0xda   :  { %v2791_v1 = vpop.f32.mrf.mxu0 }
  0xdc   :  { %v2793_v3 = vpop.f32.mrf.mxu0 }
  0xdd   :  { %v187_v54 = vadd.f32 %v2729_v17, %v2793_v3 }
  0xde   :  { %v2795_v5 = vpop.f32.mrf.mxu0 }
  0xe0   :  { %v2797_v7 = vpop.f32.mrf.mxu0 }
  0xe1   :  { %v2511_v22 = vpop.eup %2510 }
  0xe2   :  { %v290_v23 = vmul.f32 0.5, %v2511_v22 }
  0xe4   :  { %v291_v24 = vadd.f32 0.5, %v290_v23 }
  0xe6   :  { %v307_v30 = vsub.f32 1.0, %v291_v24  ;;  %v313_v32 = vmul.f32 0.0, %v291_v24 }
 0x13f   :  { %v298_v25 = vpop.permute.xlu0 %297 }
 0x140   :  { %v300_v26 = vmul.f32 %v298_v25, %v291_v24 }
 0x142   :  { %302 = vrot.lane.b32.xlu1 %v300_v26, %s2577_s18 }
 0x1b4   :  { %v303_v27 = vpop.permute.xlu1 %302 }
 0x1b5   :  { %v305_v28 = vadd.f32 %v303_v27, %v167_v19 }
 0x1b7   :  { %2512 = vtanh.f32 %v305_v28 }
 0x1c4   :  { %v2513_v29 = vpop.eup %2512 }
 0x1c5   :  { %309 = vrot.lane.b32.xlu1 %v2513_v29, %s2578_s20 }
 0x237   :  { %v310_v31 = vpop.permute.xlu1 %309 }
 0x238   :  { %v312_v33 = vmul.f32 %v310_v31, %v307_v30 }
 0x23a   :  { %v314_v34 = vadd.f32 %v313_v32, %v312_v33 }
 0x23c   :  { %316 = vrot.lane.b32.xlu0 %v314_v34, %s2578_s20 }
 0x2ae   :  { %v317_v35 = vpop.permute.xlu0 %316 }
 0x2af   :  { %319 = vst.msk [vmem:[#allocation3] sm:$0xff] %vm75_vm1, %v317_v35  ;;  %2295 = vmatmul.mubr.msk.f32.vlgmr.msra.gmra.mxu1 %vm75_vm1, %v317_v35 }
 0x2b0   :  { %2309 = vmatpush3.msra.mxu1 %v2654_v2  ;;  %2316 = vmatprep.mubr.msk.f32.mxu1 %vm2576_vm0, %v2575_v0 }
 0x2b1   :  { %2310 = vmatprep.subr.mxu1 %v2575_v0 }
 0x2b2   :  { %2311 = vmatpush3.msra.mxu1 %v2665_v4 }
 0x2b3   :  { %2312 = vmatprep.subr.mxu1 %v2575_v0 }
 0x2b4   :  { %2313 = vmatpush3.msra.mxu1 %v2674_v6 }
 0x2b5   :  { %2314 = vmatprep.subr.mxu1 %v2575_v0 }
 0x2b6   :  { %2315 = vmatpush3.msra.mxu1 %v2684_v8 }
 0x2b7   :  { %2330 = vmatprep.subr.mxu1 %v2575_v0 }
 0x36f   :  { %v390_v36 = vpop.f32.mrf.mxu1 }
 0x370   :  { %v399_v37 = vadd.f32 %v390_v36, %v2722_v12  ;;  %v394_v40 = vadd.f32 %v390_v36, %v172_v39 }
 0x371   :  { %v2296_v38 = vpop.f32.mrf.mxu1 }
 0x372   :  { %401 = vrot.lane.b32.xlu1 %v399_v37, %s2577_s18  ;;  %v395_v41 = vmul.f32 0.5, %v394_v40 }
 0x374   :  { %2514 = vtanh.f32 %v395_v41 }
 0x381   :  { %v2515_v42 = vpop.eup %2514 }
 0x382   :  { %v397_v43 = vmul.f32 0.5, %v2515_v42 }
 0x384   :  { %v398_v44 = vadd.f32 0.5, %v397_v43 }
 0x386   :  { %v411_v56 = vsub.f32 1.0, %v398_v44  ;;  %v417_v58 = vmul.f32 %v398_v44, %v314_v34  ;;  %v182_v34 = vadd.f32 %v2268_v62, %v2729_v17 }
 0x3e4   :  { %v402_v45 = vpop.permute.xlu1 %401 }
 0x3e5   :  { %v404_v46 = vmul.f32 %v402_v45, %v398_v44 }
 0x3e7   :  { %406 = vrot.lane.b32.xlu0 %v404_v46, %s2577_s18 }
 0x459   :  { %v407_v47 = vpop.permute.xlu0 %406 }
 0x45a   :  { %v409_v48 = vadd.f32 %v407_v47, %v172_v39 }
 0x45c   :  { %2516 = vtanh.f32 %v409_v48 }
 0x469   :  { %v2517_v55 = vpop.eup %2516 }
 0x46a   :  { %413 = vrot.lane.b32.xlu1 %v2517_v55, %s2578_s20 }
 0x4dc   :  { %v414_v57 = vpop.permute.xlu1 %413 }
 0x4dd   :  { %v416_v59 = vmul.f32 %v414_v57, %v411_v56 }
 0x4df   :  { %v418_v60 = vadd.f32 %v417_v58, %v416_v59 }
 0x4e1   :  { %420 = vrot.lane.b32.xlu0 %v418_v60, %s2578_s20 }
 0x553   :  { %v421_v61 = vpop.permute.xlu0 %420 }
 0x554   :  { %424 = vst.msk [vmem:[#allocation3 + $0x8] sm:$0xff] %vm75_vm1, %v421_v61  ;;  %2306 = vmatmul.mubr.msk.f32.vlgmr.msra.gmra.mxu0 %vm75_vm1, %v421_v61 }
 0x555   :  { %2320 = vmatpush3.msra.mxu0 %v2654_v2  ;;  %2327 = vmatprep.mubr.msk.f32.mxu0 %vm2576_vm0, %v2575_v0 }
 0x556   :  { %2321 = vmatprep.subr.mxu0 %v2575_v0 }
 0x557   :  { %2322 = vmatpush3.msra.mxu0 %v2665_v4 }
 0x558   :  { %2323 = vmatprep.subr.mxu0 %v2575_v0 }
 0x559   :  { %2324 = vmatpush3.msra.mxu0 %v2674_v6 }
 0x55a   :  { %2325 = vmatprep.subr.mxu0 %v2575_v0 }
 0x55b   :  { %2326 = vmatpush3.msra.mxu0 %v2684_v8 }
 0x55c   :  { %2341 = vmatprep.subr.mxu0 %v2575_v0 }
 0x614   :  { %v495_v9 = vpop.f32.mrf.mxu0 }
 0x615   :  { %v504_v10 = vadd.f32 %v495_v9, %v2722_v12  ;;  %v499_v14 = vadd.f32 %v495_v9, %v177_v13 }
 0x616   :  { %v2307_v11 = vpop.f32.mrf.mxu0 }
 0x617   :  { %506 = vrot.lane.b32.xlu1 %v504_v10, %s2577_s18  ;;  %v500_v15 = vmul.f32 0.5, %v499_v14 }
 0x619   :  { %2518 = vtanh.f32 %v500_v15 }
 0x626   :  { %v2519_v16 = vpop.eup %2518 }
 0x627   :  { %v502_v18 = vmul.f32 0.5, %v2519_v16 }
 0x629   :  { %v503_v19 = vadd.f32 0.5, %v502_v18 }
 0x62b   :  { %v516_v25 = vsub.f32 1.0, %v503_v19  ;;  %v522_v27 = vmul.f32 %v503_v19, %v418_v60 }
 0x689   :  { %v507_v20 = vpop.permute.xlu1 %506 }
 0x68a   :  { %v509_v21 = vmul.f32 %v507_v20, %v503_v19  ;;  %v192_v19 = vadd.f32 %v2791_v1, %v2729_v17 }
 0x68c   :  { %511 = vrot.lane.b32.xlu0 %v509_v21, %s2577_s18 }
 0x6fe   :  { %v512_v22 = vpop.permute.xlu0 %511 }
 0x6ff   :  { %v514_v23 = vadd.f32 %v512_v22, %v177_v13 }
 0x701   :  { %2520 = vtanh.f32 %v514_v23 }
 0x70e   :  { %v2521_v24 = vpop.eup %2520 }
 0x70f   :  { %518 = vrot.lane.b32.xlu1 %v2521_v24, %s2578_s20 }
 0x781   :  { %v519_v26 = vpop.permute.xlu1 %518 }
 0x782   :  { %v521_v28 = vmul.f32 %v519_v26, %v516_v25  ;;  %v1088_v26 = vld [vmem:[%s3137_s5 + $0x78] sm:$0xff] }
 0x784   :  { %v523_v29 = vadd.f32 %v522_v27, %v521_v28 }
 0x786   :  { %525 = vrot.lane.b32.xlu0 %v523_v29, %s2578_s20 }
 0x7f8   :  { %v526_v30 = vpop.permute.xlu0 %525 }
 0x7f9   :  { %529 = vst.msk [vmem:[#allocation3 + $0x10] sm:$0xff] %vm75_vm1, %v526_v30  ;;  %2317 = vmatmul.mubr.msk.f32.vlgmr.msra.gmra.mxu1 %vm75_vm1, %v526_v30 }
 0x7fa   :  { %2331 = vmatpush3.msra.mxu1 %v2654_v2  ;;  %2338 = vmatprep.mubr.msk.f32.mxu1 %vm2576_vm0, %v2575_v0 }
 0x7fb   :  { %2332 = vmatprep.subr.mxu1 %v2575_v0 }
 0x7fc   :  { %2333 = vmatpush3.msra.mxu1 %v2665_v4 }
 0x7fd   :  { %2334 = vmatprep.subr.mxu1 %v2575_v0 }
 0x7fe   :  { %2335 = vmatpush3.msra.mxu1 %v2674_v6 }
 0x7ff   :  { %2336 = vmatprep.subr.mxu1 %v2575_v0 }
 0x800   :  { %2337 = vmatpush3.msra.mxu1 %v2684_v8 }
 0x801   :  { %2352 = vmatprep.subr.mxu1 %v2575_v0 }
 0x8b9   :  { %v600_v31 = vpop.f32.mrf.mxu1 }
 0x8ba   :  { %v609_v32 = vadd.f32 %v600_v31, %v2722_v12  ;;  %v604_v35 = vadd.f32 %v600_v31, %v182_v34 }
 0x8bb   :  { %v2318_v33 = vpop.f32.mrf.mxu1 }
 0x8bc   :  { %611 = vrot.lane.b32.xlu1 %v609_v32, %s2577_s18  ;;  %v605_v36 = vmul.f32 0.5, %v604_v35  ;;  %v1087_v33 = vld [vmem:[%s3137_s5 + $0x70] sm:$0xff]  ;;  %v1086_v35 = vld [vmem:[%s3137_s5 + $0x68] sm:$0xff] }
 0x8be   :  { %2522 = vtanh.f32 %v605_v36  ;;  %v1085_v36 = vld [vmem:[%s3137_s5 + $0x60] sm:$0xff] }
 0x8cb   :  { %v2523_v37 = vpop.eup %2522 }
 0x8cc   :  { %v607_v38 = vmul.f32 0.5, %v2523_v37  ;;  %v1084_v37 = vld [vmem:[%s3137_s5 + $0x58] sm:$0xff] }
 0x8ce   :  { %v608_v39 = vadd.f32 0.5, %v607_v38  ;;  %v1083_v38 = vld [vmem:[%s3137_s5 + $0x50] sm:$0xff] }
 0x8d0   :  { %v621_v45 = vsub.f32 1.0, %v608_v39  ;;  %v627_v47 = vmul.f32 %v608_v39, %v523_v29 }
 0x92e   :  { %v612_v40 = vpop.permute.xlu1 %611 }
 0x92f   :  { %v614_v41 = vmul.f32 %v612_v40, %v608_v39  ;;  %v1082_v39 = vld [vmem:[%s3137_s5 + $0x48] sm:$0xff]  ;;  %v1081_v40 = vld [vmem:[%s3137_s5 + $0x40] sm:$0xff] }
 0x931   :  { %616 = vrot.lane.b32.xlu0 %v614_v41, %s2577_s18  ;;  %v1080_v41 = vld [vmem:[%s3137_s5 + $0x38] sm:$0xff] }
 0x9a3   :  { %v617_v42 = vpop.permute.xlu0 %616 }
 0x9a4   :  { %v619_v43 = vadd.f32 %v617_v42, %v182_v34  ;;  %v1065_v34 = vld [vmem:[#allocation3] sm:$0xff]  ;;  %v1079_v42 = vld [vmem:[%s3137_s5 + $0x30] sm:$0xff] }
 0x9a6   :  { %2524 = vtanh.f32 %v619_v43  ;;  %v1078_v43 = vld [vmem:[%s3137_s5 + $0x28] sm:$0xff] }
 0x9b3   :  { %v2525_v44 = vpop.eup %2524 }
 0x9b4   :  { %623 = vrot.lane.b32.xlu1 %v2525_v44, %s2578_s20  ;;  %v1077_v44 = vld [vmem:[%s3137_s5 + $0x20] sm:$0xff] }
 0xa26   :  { %v624_v46 = vpop.permute.xlu1 %623 }
 0xa27   :  { %v626_v48 = vmul.f32 %v624_v46, %v621_v45  ;;  %v1076_v45 = vld [vmem:[%s3137_s5 + $0x18] sm:$0xff]  ;;  %v1075_v46 = vld [vmem:[%s3137_s5 + $0x10] sm:$0xff] }
 0xa29   :  { %v628_v49 = vadd.f32 %v627_v47, %v626_v48  ;;  %v1074_v47 = vld [vmem:[%s3137_s5 + $0x8] sm:$0xff]  ;;  %v1073_v48 = vld [vmem:[%s3137_s5] sm:$0xff] }
 0xa2b   :  { %630 = vrot.lane.b32.xlu0 %v628_v49, %s2578_s20 }
 0xa9d   :  { %v631_v50 = vpop.permute.xlu0 %630 }
 0xa9e   :  { %634 = vst.msk [vmem:[#allocation3 + $0x18] sm:$0xff] %vm75_vm1, %v631_v50  ;;  %2328 = vmatmul.mubr.msk.f32.vlgmr.msra.gmra.mxu0 %vm75_vm1, %v631_v50  ;;  %v1067_v50 = vld [vmem:[#allocation3 + $0x10] sm:$0xff] }
 0xa9f   :  { %2342 = vmatpush3.msra.mxu0 %v2654_v2  ;;  %2349 = vmatprep.mubr.msk.f32.mxu0 %vm2576_vm0, %v2575_v0 }
 0xaa0   :  { %2343 = vmatprep.subr.mxu0 %v2575_v0 }
 0xaa1   :  { %2344 = vmatpush3.msra.mxu0 %v2665_v4 }
 0xaa2   :  { %2345 = vmatprep.subr.mxu0 %v2575_v0 }
 0xaa3   :  { %2346 = vmatpush3.msra.mxu0 %v2674_v6 }
 0xaa4   :  { %2347 = vmatprep.subr.mxu0 %v2575_v0 }
 0xaa5   :  { %2348 = vmatpush3.msra.mxu0 %v2684_v8 }
 0xaa6   :  { %2363 = vmatprep.subr.mxu0 %v1088_v26 }
 0xb5e   :  { %v705_v51 = vpop.f32.mrf.mxu0 }
 0xb5f   :  { %v714_v52 = vadd.f32 %v705_v51, %v2722_v12  ;;  %v709_v55 = vadd.f32 %v705_v51, %v187_v54  ;;  %v1068_v51 = vld [vmem:[#allocation3 + $0x18] sm:$0xff] }
 0xb60   :  { %v2329_v53 = vpop.f32.mrf.mxu0 }
 0xb61   :  { %716 = vrot.lane.b32.xlu1 %v714_v52, %s2577_s18  ;;  %v710_v56 = vmul.f32 0.5, %v709_v55 }
 0xb63   :  { %2526 = vtanh.f32 %v710_v56 }
 0xb70   :  { %v2527_v57 = vpop.eup %2526 }
 0xb71   :  { %v712_v58 = vmul.f32 0.5, %v2527_v57  ;;  %v197_v57 = vadd.f32 %v2729_v17, %v2797_v7  ;;  %v2923_v7 = vld [vmem:[%s3138_s6 + $0x18] sm:$0xff] }
 0xb73   :  { %v713_v59 = vadd.f32 0.5, %v712_v58 }
 0xb75   :  { %v726_v10 = vsub.f32 1.0, %v713_v59  ;;  %v732_v13 = vmul.f32 %v713_v59, %v628_v49  ;;  %v1066_v49 = vld [vmem:[#allocation3 + $0x8] sm:$0xff] }
 0xbd3   :  { %v717_v60 = vpop.permute.xlu1 %716 }
 0xbd4   :  { %v719_v61 = vmul.f32 %v717_v60, %v713_v59 }
 0xbd6   :  { %721 = vrot.lane.b32.xlu0 %v719_v61, %s2577_s18 }
 0xc48   :  { %v722_v62 = vpop.permute.xlu0 %721 }
 0xc49   :  { %v724_v63 = vadd.f32 %v722_v62, %v187_v54 }
 0xc4b   :  { %2528 = vtanh.f32 %v724_v63 }
 0xc58   :  { %v2529_v9 = vpop.eup %2528 }
 0xc59   :  { %728 = vrot.lane.b32.xlu1 %v2529_v9, %s2578_s20 }
 0xccb   :  { %v729_v11 = vpop.permute.xlu1 %728 }
 0xccc   :  { %v731_v3 = vmul.f32 %v729_v11, %v726_v10 }
 0xcce   :  { %v733_v14 = vadd.f32 %v732_v13, %v731_v3  ;;  %v2929_v3 = vld [vmem:[%s3138_s6 + $0x10] sm:$0xff] }
 0xcd0   :  { %735 = vrot.lane.b32.xlu0 %v733_v14, %s2578_s20 }
 0xd42   :  { %v736_v15 = vpop.permute.xlu0 %735 }
 0xd43   :  { %739 = vst.msk [vmem:[#allocation3 + $0x20] sm:$0xff] %vm75_vm1, %v736_v15  ;;  %2339 = vmatmul.mubr.msk.f32.vlgmr.msra.gmra.mxu1 %vm75_vm1, %v736_v15  ;;  %v2943_v15 = vld [vmem:[%s3138_s6] sm:$0xff] }
 0xd44   :  { %2353 = vmatpush3.msra.mxu1 %v2654_v2  ;;  %2360 = vmatprep.mubr.msk.f32.mxu1 %vm2576_vm0, %v2575_v0 }
 0xd45   :  { %2354 = vmatprep.subr.mxu1 %v2575_v0 }
 0xd46   :  { %2355 = vmatpush3.msra.mxu1 %v2665_v4 }
 0xd47   :  { %2356 = vmatprep.subr.mxu1 %v2575_v0 }
 0xd48   :  { %2357 = vmatpush3.msra.mxu1 %v2674_v6 }
 0xd49   :  { %2358 = vmatprep.subr.mxu1 %v2575_v0 }
 0xd4a   :  { %2359 = vmatpush3.msra.mxu1 %v2684_v8  ;;  %v1069_v52 = vld [vmem:[#allocation3 + $0x20] sm:$0xff] }
 0xd4b   :  { %2407 = vmatprep.subr.mxu1 %v2575_v0 }
 0xe03   :  { %v810_v16 = vpop.f32.mrf.mxu1 }
 0xe04   :  { %v819_v2 = vadd.f32 %v810_v16, %v2722_v12  ;;  %v814_v4 = vadd.f32 %v810_v16, %v192_v19 }
 0xe05   :  { %v2340_v18 = vpop.f32.mrf.mxu1 }
 0xe06   :  { %821 = vrot.lane.b32.xlu1 %v819_v2, %s2577_s18  ;;  %v815_v20 = vmul.f32 0.5, %v814_v4  ;;  %v2123_v4 = vld [vmem:[%s3139_s8] ss:$0 sm:$0xff] }
 0xe08   :  { %2530 = vtanh.f32 %v815_v20 }
 0xe15   :  { %v2531_v21 = vpop.eup %2530 }
 0xe16   :  { %v817_v6 = vmul.f32 0.5, %v2531_v21 }
 0xe18   :  { %v818_v22 = vadd.f32 0.5, %v817_v6 }
 0xe1a   :  { %v831_v1 = vsub.f32 1.0, %v818_v22  ;;  %v837_v29 = vmul.f32 %v818_v22, %v733_v14  ;;  %v2936_v14 = vld [vmem:[%s3138_s6 + $0x8] sm:$0xff] }
 0xe78   :  { %v822_v23 = vpop.permute.xlu1 %821 }
 0xe79   :  { %v824_v24 = vmul.f32 %v822_v23, %v818_v22 }
 0xe7b   :  { %826 = vrot.lane.b32.xlu0 %v824_v24, %s2577_s18 }
 0xeed   :  { %v827_v8 = vpop.permute.xlu0 %826 }
 0xeee   :  { %v829_v25 = vadd.f32 %v827_v8, %v192_v19 }
 0xef0   :  { %2532 = vtanh.f32 %v829_v25 }
 0xefd   :  { %v2533_v27 = vpop.eup %2532 }
 0xefe   :  { %833 = vrot.lane.b32.xlu1 %v2533_v27, %s2578_s20 }
 0xf70   :  { %v834_v28 = vpop.permute.xlu1 %833 }
 0xf71   :  { %v836_v30 = vmul.f32 %v834_v28, %v831_v1  ;;  %v2989_v28 = vld [vmem:[%s3140_s7] ss:$0 sm:$0xff] }
 0xf73   :  { %v2862_v31 = vadd.f32 %v837_v29, %v836_v30 }
 0xf75   :  { %840 = vrot.lane.b32.xlu0 %v2862_v31, %s2578_s20 }
 0xfe7   :  { %v841_v32 = vpop.permute.xlu0 %840 }
 0xfe8   :  { %844 = vst.msk [vmem:[#allocation3 + $0x28] sm:$0xff] %vm75_vm1, %v841_v32  ;;  %2350 = vmatmul.mubr.msk.f32.vlgmr.msra.gmra.mxu0 %vm75_vm1, %v841_v32 }
 0xfe9   :  { %2364 = vmatpush3.msra.mxu0 %v1088_v26  ;;  %2395 = vmatprep.mubr.f32.mxu0 %v1065_v34 }
 0xfea   :  { %2365 = vmatprep.subr.mxu0 %v1087_v33 }
 0xfeb   :  { %2366 = vmatpush3.msra.mxu0 %v1087_v33 }
 0xfec   :  { %2367 = vmatprep.subr.mxu0 %v1086_v35 }
 0xfed   :  { %2368 = vmatpush3.msra.mxu0 %v1086_v35 }
 0xfee   :  { %2369 = vmatprep.subr.mxu0 %v1085_v36 }
 0xfef   :  { %2370 = vmatpush3.msra.mxu0 %v1085_v36  ;;  %v1070_v53 = vld [vmem:[#allocation3 + $0x28] sm:$0xff] }
 0xff0   :  { %2371 = vmatprep.subr.mxu0 %v1084_v37 }
 0xff1   :  { %2372 = vmatpush3.msra.mxu0 %v1084_v37 }
 0xff2   :  { %2373 = vmatprep.subr.mxu0 %v1083_v38 }
 0xff3   :  { %2374 = vmatpush3.msra.mxu0 %v1083_v38 }
 0xff4   :  { %2375 = vmatprep.subr.mxu0 %v1082_v39 }
 0xff5   :  { %2376 = vmatpush3.msra.mxu0 %v1082_v39 }
 0xff6   :  { %2377 = vmatprep.subr.mxu0 %v1081_v40 }
 0xff7   :  { %2378 = vmatpush3.msra.mxu0 %v1081_v40 }
 0xff8   :  { %2379 = vmatprep.subr.mxu0 %v1080_v41 }
 0xff9   :  { %2380 = vmatpush3.msra.mxu0 %v1080_v41 }
 0xffa   :  { %2381 = vmatprep.subr.mxu0 %v1079_v42 }
 0xffb   :  { %2382 = vmatpush3.msra.mxu0 %v1079_v42 }
 0xffc   :  { %2383 = vmatprep.subr.mxu0 %v1078_v43 }
 0xffd   :  { %2384 = vmatpush3.msra.mxu0 %v1078_v43 }
 0xffe   :  { %2385 = vmatprep.subr.mxu0 %v1077_v44 }
 0xfff   :  { %2386 = vmatpush3.msra.mxu0 %v1077_v44 }
0x1000   :  { %2387 = vmatprep.subr.mxu0 %v1076_v45 }
0x1001   :  { %2388 = vmatpush3.msra.mxu0 %v1076_v45 }
0x1002   :  { %2389 = vmatprep.subr.mxu0 %v1075_v46 }
0x1003   :  { %2390 = vmatpush3.msra.mxu0 %v1075_v46 }
0x1004   :  { %2391 = vmatprep.subr.mxu0 %v1074_v47 }
0x1005   :  { %2392 = vmatpush3.msra.mxu0 %v1074_v47 }
0x1006   :  { %2393 = vmatprep.subr.mxu0 %v1073_v48 }
0x1007   :  { %2394 = vmatpush3.msra.mxu0 %v1073_v48 }
0x1008   :  { %2396 = vmatmul.mubr.f32.vlgmr.msra.gmra.mxu0 %v1066_v49  ;;  %2462 = vmatprep.subr.mxu0 %v2575_v0 }
0x1009   :  { %2398 = vmatprep.mubr.f32.mxu0 %v1067_v50  ;;  %2463 = vmatpush3.msra.mxu0 %v2923_v7 }
0x100a   :  { %2464 = vmatprep.subr.mxu0 %v2575_v0 }
0x100b   :  { %2465 = vmatpush3.msra.mxu0 %v2929_v3 }
0x100c   :  { %2399 = vmatmul.mubr.f32.gmra.mxu0 %v1068_v51  ;;  %2466 = vmatprep.subr.mxu0 %v2575_v0 }
0x100d   :  { %2401 = vmatprep.mubr.f32.mxu0 %v1069_v52  ;;  %2467 = vmatpush3.msra.mxu0 %v2936_v14 }
0x100e   :  { %2468 = vmatprep.subr.mxu0 %v2575_v0 }
0x100f   :  { %2469 = vmatpush3.msra.mxu0 %v2943_v15 }
0x1010   :  { %2402 = vmatmul.mubr.f32.gmra.mxu0 %v1070_v53  ;;  %2484 = vmatprep.subr.mxu0 %v2575_v0 }
0x10a8   :  { %v915_v54 = vpop.f32.mrf.mxu0 }
0x10a9   :  { %v924_v55 = vadd.f32 %v915_v54, %v2722_v12  ;;  %v919_v58 = vadd.f32 %v915_v54, %v197_v57 }
0x10aa   :  { %v2351_v56 = vpop.f32.mrf.mxu0 }
0x10ab   :  { %926 = vrot.lane.b32.xlu1 %v924_v55, %s2577_s18  ;;  %v920_v59 = vmul.f32 0.5, %v919_v58 }
0x10ad   :  { %2534 = vtanh.f32 %v920_v59 }
0x10ba   :  { %v2535_v60 = vpop.eup %2534 }
0x10bb   :  { %v922_v61 = vmul.f32 0.5, %v2535_v60 }
0x10bd   :  { %v923_v62 = vadd.f32 0.5, %v922_v61 }
0x10bf   :  { %v936_v16 = vsub.f32 1.0, %v923_v62  ;;  %v942_v18 = vmul.f32 %v923_v62, %v2862_v31 }
0x10c8   :  { %v2397_v27 = vpop.f32.mrf.mxu0 }
0x10c9   :  { %v1168_v49 = vadd.f32 %v2397_v27, %v2989_v28 }
0x10ca   :  { %v1162_v1 = vpop.f32.mrf.mxu0 }
0x10cb   :  { %v1163_v29 = vadd.f32 %v2989_v28, %v1162_v1 }
0x111d   :  { %v927_v63 = vpop.permute.xlu1 %926 }
0x111e   :  { %v929_v9 = vmul.f32 %v927_v63, %v923_v62 }
0x1120   :  { %931 = vrot.lane.b32.xlu0 %v929_v9, %s2577_s18 }
0x1192   :  { %v932_v10 = vpop.permute.xlu0 %931 }
0x1193   :  { %v934_v11 = vadd.f32 %v932_v10, %v197_v57 }
0x1195   :  { %2536 = vtanh.f32 %v934_v11 }
0x11a2   :  { %v2537_v13 = vpop.eup %2536 }
0x11a3   :  { %938 = vrot.lane.b32.xlu1 %v2537_v13, %s2578_s20 }
0x11a7   :  { %1285 = vrot.lane.b32.xlu1 %v2123_v4, %s2577_s18 }
0x1215   :  { %v939_v2 = vpop.permute.xlu1 %938 }
0x1216   :  { %v941_v19 = vmul.f32 %v939_v2, %v936_v16  ;;  %v2400_v2 = vpop.f32.mrf.mxu0 }
0x1218   :  { %v2953_v20 = vadd.f32 %v942_v18, %v941_v19  ;;  %v1172_v18 = vpop.f32.mrf.mxu0 }
0x1219   :  { %v2982_v24 = vpop.permute.xlu1 %1285  ;;  %v1173_v19 = vadd.f32 %v2989_v28, %v1172_v18 }
0x121a   :  { %945 = vrot.lane.b32.xlu0 %v2953_v20, %s2578_s20 }
0x128c   :  { %v946_v21 = vpop.permute.xlu0 %945 }
0x128d   :  { %949 = vst.msk [vmem:[#allocation3 + $0x30] sm:$0xff] %vm75_vm1, %v946_v21  ;;  %2361 = vmatmul.mubr.msk.f32.vlgmr.msra.gmra.mxu1 %vm75_vm1, %v946_v21 }
0x128e   :  { %2408 = vmatpush3.msra.mxu1 %v2923_v7  ;;  %2415 = vmatprep.mubr.msk.f32.mxu1 %vm2576_vm0, %v2575_v0 }
0x128f   :  { %2409 = vmatprep.subr.mxu1 %v2575_v0 }
0x1290   :  { %2410 = vmatpush3.msra.mxu1 %v2929_v3 }
0x1291   :  { %2411 = vmatprep.subr.mxu1 %v2575_v0 }
0x1292   :  { %2412 = vmatpush3.msra.mxu1 %v2936_v14 }
0x1293   :  { %2413 = vmatprep.subr.mxu1 %v2575_v0 }
0x1294   :  { %2414 = vmatpush3.msra.mxu1 %v2943_v15  ;;  %v1071_v6 = vld [vmem:[#allocation3 + $0x30] sm:$0xff] }
0x1295   :  { %2416 = vmatmul.mubr.f32.vlgmr.msra.gmra.mxu1 %v2575_v0  ;;  %2404 = vmatprep.mubr.f32.mxu0 %v1071_v6 }
0x1296   :  { %2418 = vmatprep.subr.mxu1 %v2575_v0  ;;  %2426 = vmatprep.mubr.msk.f32.mxu1 %vm2576_vm0, %v2575_v0 }
0x1297   :  { %2419 = vmatpush3.msra.mxu1 %v2923_v7 }
0x1298   :  { %2420 = vmatprep.subr.mxu1 %v2575_v0 }
0x1299   :  { %2421 = vmatpush3.msra.mxu1 %v2929_v3 }
0x129a   :  { %2422 = vmatprep.subr.mxu1 %v2575_v0 }
0x129b   :  { %2423 = vmatpush3.msra.mxu1 %v2936_v14 }
0x129c   :  { %2424 = vmatprep.subr.mxu1 %v2575_v0 }
0x129d   :  { %2425 = vmatpush3.msra.mxu1 %v2943_v15 }
0x129e   :  { %2429 = vmatprep.subr.mxu1 %v2575_v0 }
0x134d   :  { %v2980_v22 = vpop.f32.mrf.mxu1 }
0x134f   :  { %v2362_v23 = vpop.f32.mrf.mxu1 }
0x1355   :  { %v1276_v8 = vpop.f32.mrf.mxu1 }
0x1356   :  { %v1288_v25 = vadd.f32 %v2982_v24, %v1276_v8  ;;  %v1280_v30 = vadd.f32 %v1276_v8, %v1163_v29 }
0x1357   :  { %v2417_v26 = vpop.f32.mrf.mxu1 }
0x1358   :  { %1290 = vrot.lane.b32.xlu0 %v1288_v25, %s2577_s18  ;;  %v1281_v31 = vmul.f32 0.5, %v1280_v30 }
0x135a   :  { %2538 = vtanh.f32 %v1281_v31 }
0x1367   :  { %v2539_v32 = vpop.eup %2538 }
0x1368   :  { %v1283_v33 = vmul.f32 0.5, %v2539_v32 }
0x136a   :  { %v1284_v34 = vadd.f32 0.5, %v1283_v33 }
0x136c   :  { %v1300_v40 = vsub.f32 1.0, %v1284_v34  ;;  %v1306_v42 = vmul.f32 0.0, %v1284_v34 }
0x13ca   :  { %v1291_v35 = vpop.permute.xlu0 %1290 }
0x13cb   :  { %v1293_v36 = vmul.f32 %v1291_v35, %v1284_v34  ;;  %v3031_v35 = vld [vmem:[#allocation3 + $0x38] sm:$0xff] }
0x13cd   :  { %1295 = vrot.lane.b32.xlu1 %v1293_v36, %s2577_s18 }
0x143f   :  { %v1296_v37 = vpop.permute.xlu1 %1295 }
0x1440   :  { %v1298_v38 = vadd.f32 %v1296_v37, %v1163_v29 }
0x1442   :  { %2540 = vtanh.f32 %v1298_v38 }
0x144f   :  { %v2541_v39 = vpop.eup %2540 }
0x1450   :  { %1302 = vrot.lane.b32.xlu0 %v2541_v39, %s2578_s20  ;;  %v1178_v39 = vadd.f32 %v2400_v2, %v2989_v28 }
0x14c2   :  { %v1303_v41 = vpop.permute.xlu0 %1302 }
0x14c3   :  { %v1305_v43 = vmul.f32 %v1303_v41, %v1300_v40 }
0x14c5   :  { %v1307_v44 = vadd.f32 %v1306_v42, %v1305_v43 }
0x14c7   :  { %1310 = vrot.lane.b32.xlu1 %v1307_v44, %s2578_s20 }
0x1539   :  { %v1311_v45 = vpop.permute.xlu1 %1310 }
0x153a   :  { %2427 = vmatmul.mubr.msk.f32.vlgmr.msra.gmra.mxu1 %vm75_vm1, %v1311_v45 }
0x153b   :  { %2430 = vmatpush3.msra.mxu1 %v2923_v7  ;;  %2437 = vmatprep.mubr.msk.f32.mxu1 %vm2576_vm0, %v2575_v0 }
0x153c   :  { %2431 = vmatprep.subr.mxu1 %v2575_v0 }
0x153d   :  { %2432 = vmatpush3.msra.mxu1 %v2929_v3 }
0x153e   :  { %2433 = vmatprep.subr.mxu1 %v2575_v0 }
0x153f   :  { %2434 = vmatpush3.msra.mxu1 %v2936_v14 }
0x1540   :  { %2435 = vmatprep.subr.mxu1 %v2575_v0 }
0x1541   :  { %2436 = vmatpush3.msra.mxu1 %v2943_v15 }
0x1542   :  { %2440 = vmatprep.subr.mxu1 %v2575_v0 }
0x15fa   :  { %v1380_v46 = vpop.f32.mrf.mxu1 }
0x15fb   :  { %v1389_v47 = vadd.f32 %v1380_v46, %v2982_v24  ;;  %v1384_v50 = vadd.f32 %v1380_v46, %v1168_v49 }
0x15fc   :  { %v2428_v48 = vpop.f32.mrf.mxu1 }
0x15fd   :  { %1391 = vrot.lane.b32.xlu0 %v1389_v47, %s2577_s18  ;;  %v1385_v51 = vmul.f32 0.5, %v1384_v50  ;;  %v1029_v50 = vadd.f32 %v2980_v22, %v2722_v12 }
0x15ff   :  { %2542 = vtanh.f32 %v1385_v51  ;;  %v202_v51 = vadd.f32 %v2795_v5, %v2729_v17 }
0x160c   :  { %v2543_v52 = vpop.eup %2542 }
0x160d   :  { %v1387_v53 = vmul.f32 0.5, %v2543_v52  ;;  %v1024_v52 = vadd.f32 %v2980_v22, %v202_v51 }
0x160f   :  { %v1388_v54 = vadd.f32 0.5, %v1387_v53  ;;  %v1025_v53 = vmul.f32 0.5, %v1024_v52 }
0x1611   :  { %v1401_v60 = vsub.f32 1.0, %v1388_v54  ;;  %v1407_v62 = vmul.f32 %v1388_v54, %v1307_v44 }
0x166f   :  { %v1392_v55 = vpop.permute.xlu0 %1391 }
0x1670   :  { %v1394_v56 = vmul.f32 %v1392_v55, %v1388_v54 }
0x1672   :  { %1396 = vrot.lane.b32.xlu1 %v1394_v56, %s2577_s18 }
0x16e4   :  { %v1397_v57 = vpop.permute.xlu1 %1396 }
0x16e5   :  { %v1399_v58 = vadd.f32 %v1397_v57, %v1168_v49 }
0x16e7   :  { %2544 = vtanh.f32 %v1399_v58 }
0x16f4   :  { %v2545_v59 = vpop.eup %2544 }
0x16f5   :  { %1403 = vrot.lane.b32.xlu0 %v2545_v59, %s2578_s20 }
0x1767   :  { %v1404_v61 = vpop.permute.xlu0 %1403 }
0x1768   :  { %v1406_v63 = vmul.f32 %v1404_v61, %v1401_v60 }
0x176a   :  { %v1408_v9 = vadd.f32 %v1407_v62, %v1406_v63 }
0x176c   :  { %1411 = vrot.lane.b32.xlu1 %v1408_v9, %s2578_s20 }
0x17de   :  { %v1412_v10 = vpop.permute.xlu1 %1411 }
0x17df   :  { %2438 = vmatmul.mubr.msk.f32.vlgmr.msra.gmra.mxu1 %vm75_vm1, %v1412_v10 }
0x17e0   :  { %2441 = vmatpush3.msra.mxu1 %v2923_v7  ;;  %2448 = vmatprep.mubr.msk.f32.mxu1 %vm2576_vm0, %v2575_v0 }
0x17e1   :  { %2442 = vmatprep.subr.mxu1 %v2575_v0 }
0x17e2   :  { %2443 = vmatpush3.msra.mxu1 %v2929_v3 }
0x17e3   :  { %2444 = vmatprep.subr.mxu1 %v2575_v0 }
0x17e4   :  { %2445 = vmatpush3.msra.mxu1 %v2936_v14 }
0x17e5   :  { %2446 = vmatprep.subr.mxu1 %v2575_v0 }
0x17e6   :  { %2447 = vmatpush3.msra.mxu1 %v2943_v15 }
0x17e7   :  { %2451 = vmatprep.subr.mxu1 %v2575_v0 }
0x189f   :  { %v1481_v11 = vpop.f32.mrf.mxu1 }
0x18a0   :  { %v1490_v13 = vadd.f32 %v1481_v11, %v2982_v24  ;;  %v1485_v4 = vadd.f32 %v1481_v11, %v1173_v19 }
0x18a1   :  { %v2439_v16 = vpop.f32.mrf.mxu1 }
0x18a2   :  { %1492 = vrot.lane.b32.xlu0 %v1490_v13, %s2577_s18  ;;  %v1486_v21 = vmul.f32 0.5, %v1485_v4 }
0x18a4   :  { %2546 = vtanh.f32 %v1486_v21 }
0x18b1   :  { %v2547_v6 = vpop.eup %2546 }
0x18b2   :  { %v1488_v23 = vmul.f32 0.5, %v2547_v6  ;;  %v2403_v6 = vpop.f32.mrf.mxu0 }
0x18b4   :  { %v1489_v8 = vadd.f32 0.5, %v1488_v23 }
0x18b6   :  { %v1502_v29 = vsub.f32 1.0, %v1489_v8  ;;  %v1508_v31 = vmul.f32 %v1489_v8, %v1408_v9 }
0x1914   :  { %v1493_v25 = vpop.permute.xlu0 %1492 }
0x1915   :  { %v1495_v26 = vmul.f32 %v1493_v25, %v1489_v8 }
0x1917   :  { %1497 = vrot.lane.b32.xlu1 %v1495_v26, %s2577_s18 }
0x1989   :  { %v1498_v0 = vpop.permute.xlu1 %1497 }
0x198a   :  { %v1500_v27 = vadd.f32 %v1498_v0, %v1173_v19 }
0x198c   :  { %2548 = vtanh.f32 %v1500_v27 }
0x1999   :  { %v2549_v1 = vpop.eup %2548 }
0x199a   :  { %1504 = vrot.lane.b32.xlu0 %v2549_v1, %s2578_s20 }
0x1a0c   :  { %v1505_v30 = vpop.permute.xlu0 %1504 }
0x1a0d   :  { %v1507_v32 = vmul.f32 %v1505_v30, %v1502_v29 }
0x1a0f   :  { %v1509_v33 = vadd.f32 %v1508_v31, %v1507_v32 }
0x1a11   :  { %1512 = vrot.lane.b32.xlu1 %v1509_v33, %s2578_s20 }
0x1a83   :  { %v1513_v34 = vpop.permute.xlu1 %1512 }
0x1a84   :  { %2449 = vmatmul.mubr.msk.f32.vlgmr.msra.gmra.mxu1 %vm75_vm1, %v1513_v34 }
0x1a85   :  { %2452 = vmatpush3.msra.mxu1 %v2923_v7  ;;  %2459 = vmatprep.mubr.msk.f32.mxu1 %vm2576_vm0, %v3031_v35 }
0x1a86   :  { %2453 = vmatprep.subr.mxu1 %v3031_v35 }
0x1a87   :  { %2454 = vmatpush3.msra.mxu1 %v2929_v3 }
0x1a88   :  { %2455 = vmatprep.subr.mxu1 %v3031_v35 }
0x1a89   :  { %2456 = vmatpush3.msra.mxu1 %v2936_v14 }
0x1a8a   :  { %2457 = vmatprep.subr.mxu1 %v3031_v35 }
0x1a8b   :  { %2458 = vmatpush3.msra.mxu1 %v2943_v15 }
0x1a8c   :  { %2473 = vmatprep.subr.mxu1 %v3031_v35 }
0x1b44   :  { %v1582_v36 = vpop.f32.mrf.mxu1 }
0x1b45   :  { %v1591_v37 = vadd.f32 %v1582_v36, %v2982_v24  ;;  %v1586_v40 = vadd.f32 %v1582_v36, %v1178_v39 }
0x1b46   :  { %v2450_v38 = vpop.f32.mrf.mxu1 }
0x1b47   :  { %1593 = vrot.lane.b32.xlu0 %v1591_v37, %s2577_s18  ;;  %v1587_v41 = vmul.f32 0.5, %v1586_v40 }
0x1b49   :  { %2550 = vtanh.f32 %v1587_v41 }
0x1b56   :  { %v2551_v42 = vpop.eup %2550 }
0x1b57   :  { %v1589_v43 = vmul.f32 0.5, %v2551_v42 }
0x1b59   :  { %v1590_v44 = vadd.f32 0.5, %v1589_v43 }
0x1b5b   :  { %v1603_v55 = vsub.f32 1.0, %v1590_v44  ;;  %v1609_v58 = vmul.f32 %v1590_v44, %v1509_v33 }
0x1bb9   :  { %v1594_v45 = vpop.permute.xlu0 %1593 }
0x1bba   :  { %v1596_v46 = vmul.f32 %v1594_v45, %v1590_v44  ;;  %v1188_v44 = vadd.f32 %v2403_v6, %v2989_v28 }
0x1bbc   :  { %1598 = vrot.lane.b32.xlu1 %v1596_v46, %s2577_s18 }
0x1c2e   :  { %v1599_v47 = vpop.permute.xlu1 %1598 }
0x1c2f   :  { %v1601_v48 = vadd.f32 %v1599_v47, %v1178_v39 }
0x1c31   :  { %2552 = vtanh.f32 %v1601_v48 }
0x1c32   :  { %2554 = vtanh.f32 %v1025_v53 }
0x1c3e   :  { %v2553_v49 = vpop.eup %2552 }
0x1c3f   :  { %1605 = vrot.lane.b32.xlu0 %v2553_v49, %s2578_s20  ;;  %v2555_v54 = vpop.eup %2554 }
0x1c40   :  { %v1027_v56 = vmul.f32 0.5, %v2555_v54 }
0x1c42   :  { %v1028_v61 = vadd.f32 0.5, %v1027_v56 }
0x1c43   :  { %1031 = vrot.lane.b32.xlu0 %v1029_v50, %s2577_s18 }
0x1c44   :  { %v1041_v9 = vsub.f32 1.0, %v1028_v61  ;;  %v1047_v11 = vmul.f32 %v1028_v61, %v2953_v20  ;;  %v1182_v20 = vpop.f32.mrf.mxu0 }
0x1c45   :  { %v1183_v23 = vadd.f32 %v2989_v28, %v1182_v20 }
0x1cb1   :  { %v1606_v57 = vpop.permute.xlu0 %1605 }
0x1cb2   :  { %v1608_v59 = vmul.f32 %v1606_v57, %v1603_v55 }
0x1cb4   :  { %v1610_v60 = vadd.f32 %v1609_v58, %v1608_v59 }
0x1cb5   :  { %v1032_v62 = vpop.permute.xlu0 %1031 }
0x1cb6   :  { %v1034_v63 = vmul.f32 %v1032_v62, %v1028_v61  ;;  %1613 = vrot.lane.b32.xlu1 %v1610_v60, %s2578_s20 }
0x1cb8   :  { %1036 = vrot.lane.b32.xlu0 %v1034_v63, %s2577_s18 }
0x1d28   :  { %v1614_v12 = vpop.permute.xlu1 %1613 }
0x1d29   :  { %2460 = vmatmul.mubr.msk.f32.vlgmr.msra.gmra.mxu1 %vm75_vm1, %v1614_v12 }
0x1d2a   :  { %v1037_v17 = vpop.permute.xlu0 %1036  ;;  %2474 = vmatpush3.msra.mxu1 %v2923_v7  ;;  %2481 = vmatprep.mubr.msk.f32.mxu1 %vm2576_vm0, %v3031_v35 }
0x1d2b   :  { %v1039_v5 = vadd.f32 %v1037_v17, %v202_v51  ;;  %2475 = vmatprep.subr.mxu1 %v3031_v35 }
0x1d2c   :  { %2476 = vmatpush3.msra.mxu1 %v2929_v3 }
0x1d2d   :  { %2556 = vtanh.f32 %v1039_v5  ;;  %2477 = vmatprep.subr.mxu1 %v3031_v35 }
0x1d2e   :  { %2478 = vmatpush3.msra.mxu1 %v2936_v14 }
0x1d2f   :  { %2479 = vmatprep.subr.mxu1 %v3031_v35 }
0x1d30   :  { %2480 = vmatpush3.msra.mxu1 %v2943_v15 }
0x1d31   :  { %2495 = vmatprep.subr.mxu1 %v3031_v35 }
0x1d3a   :  { %v2557_v22 = vpop.eup %2556 }
0x1d3b   :  { %1043 = vrot.lane.b32.xlu0 %v2557_v22, %s2578_s20 }
0x1dad   :  { %v1044_v10 = vpop.permute.xlu0 %1043 }
0x1dae   :  { %v1046_v13 = vmul.f32 %v1044_v10, %v1041_v9 }
0x1db0   :  { %v1048_v16 = vadd.f32 %v1047_v11, %v1046_v13 }
0x1db2   :  { %1050 = vrot.lane.b32.xlu0 %v1048_v16, %s2578_s20 }
0x1de9   :  { %v1683_v2 = vpop.f32.mrf.mxu1 }
0x1dea   :  { %v1692_v18 = vadd.f32 %v1683_v2, %v2982_v24  ;;  %v1687_v8 = vadd.f32 %v1683_v2, %v1183_v23 }
0x1deb   :  { %v2461_v19 = vpop.f32.mrf.mxu1 }
0x1dec   :  { %1694 = vrot.lane.b32.xlu1 %v1692_v18, %s2577_s18  ;;  %v1688_v25 = vmul.f32 0.5, %v1687_v8 }
0x1dee   :  { %2558 = vtanh.f32 %v1688_v25 }
0x1dfb   :  { %v2559_v26 = vpop.eup %2558 }
0x1dfc   :  { %v1690_v0 = vmul.f32 0.5, %v2559_v26 }
0x1dfe   :  { %v1691_v27 = vadd.f32 0.5, %v1690_v0 }
0x1e00   :  { %v1704_v33 = vsub.f32 1.0, %v1691_v27  ;;  %v1710_v36 = vmul.f32 %v1691_v27, %v1610_v60 }
0x1e24   :  { %v1051_v4 = vpop.permute.xlu0 %1050 }
0x1e25   :  { %1054 = vst.msk [vmem:[#allocation3 + $0x38] sm:$0xff] %vm75_vm1, %v1051_v4 }
0x1e2c   :  { %v1072_v21 = vld [vmem:[#allocation3 + $0x38] sm:$0xff] }
0x1e2d   :  { %2405 = vmatmul.mubr.f32.gmra.mxu0 %v1072_v21 }
0x1e2e   :  { %2470 = vmatprep.mubr.msk.f32.mxu0 %vm2576_vm0, %v3031_v35 }
0x1e5e   :  { %v1695_v1 = vpop.permute.xlu1 %1694 }
0x1e5f   :  { %v1697_v29 = vmul.f32 %v1695_v1, %v1691_v27 }
0x1e61   :  { %1699 = vrot.lane.b32.xlu1 %v1697_v29, %s2577_s18 }
0x1ed3   :  { %v1700_v30 = vpop.permute.xlu1 %1699 }
0x1ed4   :  { %v1702_v31 = vadd.f32 %v1700_v30, %v1183_v23 }
0x1ed6   :  { %2560 = vtanh.f32 %v1702_v31 }
0x1ee3   :  { %v2561_v32 = vpop.eup %2560 }
0x1ee4   :  { %1706 = vrot.lane.b32.xlu1 %v2561_v32, %s2578_s20 }
0x1eed   :  { %v2406_v40 = vpop.f32.mrf.mxu0 }
0x1eee   :  { %v1198_v8 = vadd.f32 %v2406_v40, %v2989_v28 }
0x1eef   :  { %v1192_v41 = vpop.f32.mrf.mxu0 }
0x1ef0   :  { %v1193_v61 = vadd.f32 %v2989_v28, %v1192_v41  ;;  %v2017_v28 = vld [vmem:[%s3141_s9 + $0x10] sm:$0xff] }
0x1f56   :  { %v1707_v34 = vpop.permute.xlu1 %1706 }
0x1f57   :  { %v1709_v37 = vmul.f32 %v1707_v34, %v1704_v33  ;;  %v2016_v33 = vld [vmem:[%s3141_s9 + $0x8] sm:$0xff]  ;;  %v2015_v34 = vld [vmem:[%s3141_s9] sm:$0xff] }
0x1f59   :  { %v1711_v38 = vadd.f32 %v1710_v36, %v1709_v37 }
0x1f5b   :  { %1714 = vrot.lane.b32.xlu1 %v1711_v38, %s2578_s20 }
0x1fcd   :  { %v1715_v39 = vpop.permute.xlu1 %1714 }
0x1fce   :  { %2471 = vmatmul.mubr.msk.f32.vlgmr.msra.gmra.mxu0 %vm75_vm1, %v1715_v39 }
0x1fcf   :  { %2485 = vmatpush3.msra.mxu0 %v2923_v7  ;;  %2492 = vmatprep.mubr.msk.f32.mxu0 %vm2576_vm0, %v3031_v35 }
0x1fd0   :  { %2486 = vmatprep.subr.mxu0 %v3031_v35 }
0x1fd1   :  { %2487 = vmatpush3.msra.mxu0 %v2929_v3 }
0x1fd2   :  { %2488 = vmatprep.subr.mxu0 %v3031_v35 }
0x1fd3   :  { %2489 = vmatpush3.msra.mxu0 %v2936_v14 }
0x1fd4   :  { %2490 = vmatprep.subr.mxu0 %v3031_v35 }
0x1fd5   :  { %2491 = vmatpush3.msra.mxu0 %v2943_v15 }
0x208e   :  { %v1784_v42 = vpop.f32.mrf.mxu0 }
0x208f   :  { %v1793_v7 = vadd.f32 %v1784_v42, %v2982_v24  ;;  %v1788_v45 = vadd.f32 %v1784_v42, %v1188_v44 }
0x2090   :  { %v2472_v43 = vpop.f32.mrf.mxu0 }
0x2091   :  { %1795 = vrot.lane.b32.xlu0 %v1793_v7, %s2577_s18  ;;  %v1789_v3 = vmul.f32 0.5, %v1788_v45  ;;  %v2132_v7 = vld [vmem:[%s3142_s10] ss:$0 sm:$0xff] }
0x2093   :  { %2562 = vtanh.f32 %v1789_v3 }
0x20a0   :  { %v2563_v46 = vpop.eup %2562 }
0x20a1   :  { %v1791_v47 = vmul.f32 0.5, %v2563_v46 }
0x20a3   :  { %v1792_v14 = vadd.f32 0.5, %v1791_v47 }
0x20a5   :  { %v1805_v52 = vsub.f32 1.0, %v1792_v14  ;;  %v1811_v54 = vmul.f32 %v1792_v14, %v1711_v38 }
0x2103   :  { %v1796_v48 = vpop.permute.xlu0 %1795 }
0x2104   :  { %v1798_v49 = vmul.f32 %v1796_v48, %v1792_v14 }
0x2106   :  { %1800 = vrot.lane.b32.xlu1 %v1798_v49, %s2577_s18 }
0x2178   :  { %v1801_v15 = vpop.permute.xlu1 %1800 }
0x2179   :  { %v1803_v50 = vadd.f32 %v1801_v15, %v1188_v44 }
0x217b   :  { %2564 = vtanh.f32 %v1803_v50 }
0x2188   :  { %v2565_v51 = vpop.eup %2564 }
0x2189   :  { %1807 = vrot.lane.b32.xlu0 %v2565_v51, %s2578_s20 }
0x21fb   :  { %v1808_v53 = vpop.permute.xlu0 %1807 }
0x21fc   :  { %v1810_v55 = vmul.f32 %v1808_v53, %v1805_v52 }
0x21fe   :  { %v1812_v56 = vadd.f32 %v1811_v54, %v1810_v55 }
0x2200   :  { %1815 = vrot.lane.b32.xlu1 %v1812_v56, %s2578_s20 }
0x2272   :  { %v1816_v57 = vpop.permute.xlu1 %1815 }
0x2273   :  { %2482 = vmatmul.mubr.msk.f32.vlgmr.msra.gmra.mxu1 %vm75_vm1, %v1816_v57 }
0x2274   :  { %2503 = vmatprep.mubr.msk.f32.mxu1 %vm2576_vm0, %v3031_v35 }
0x2333   :  { %v1885_v58 = vpop.f32.mrf.mxu1 }
0x2334   :  { %v1894_v59 = vadd.f32 %v1885_v58, %v2982_v24  ;;  %v1889_v62 = vadd.f32 %v1885_v58, %v1193_v61 }
0x2335   :  { %v2483_v60 = vpop.f32.mrf.mxu1 }
0x2336   :  { %1896 = vrot.lane.b32.xlu0 %v1894_v59, %s2577_s18  ;;  %v1890_v63 = vmul.f32 0.5, %v1889_v62 }
0x2338   :  { %2566 = vtanh.f32 %v1890_v63 }
0x2345   :  { %v2567_v12 = vpop.eup %2566 }
0x2346   :  { %v1892_v17 = vmul.f32 0.5, %v2567_v12 }
0x2348   :  { %v1893_v5 = vadd.f32 0.5, %v1892_v17 }
0x234a   :  { %v1906_v16 = vsub.f32 1.0, %v1893_v5  ;;  %v1912_v18 = vmul.f32 %v1893_v5, %v1812_v56 }
0x23a8   :  { %v1897_v22 = vpop.permute.xlu0 %1896 }
0x23a9   :  { %v1899_v9 = vmul.f32 %v1897_v22, %v1893_v5 }
0x23ab   :  { %1901 = vrot.lane.b32.xlu1 %v1899_v9, %s2577_s18 }
0x241d   :  { %v1902_v10 = vpop.permute.xlu1 %1901 }
0x241e   :  { %v1904_v11 = vadd.f32 %v1902_v10, %v1193_v61 }
0x2420   :  { %2568 = vtanh.f32 %v1904_v11 }
0x242d   :  { %v2569_v13 = vpop.eup %2568 }
0x242e   :  { %1908 = vrot.lane.b32.xlu0 %v2569_v13, %s2578_s20 }
0x24a0   :  { %v1909_v2 = vpop.permute.xlu0 %1908 }
0x24a1   :  { %v1911_v19 = vmul.f32 %v1909_v2, %v1906_v16 }
0x24a3   :  { %v1913_v4 = vadd.f32 %v1912_v18, %v1911_v19 }
0x24a5   :  { %1916 = vrot.lane.b32.xlu1 %v1913_v4, %s2578_s20 }
0x2517   :  { %v1917_v21 = vpop.permute.xlu1 %1916 }
0x2518   :  { %2493 = vmatmul.mubr.msk.f32.vlgmr.msra.gmra.mxu0 %vm75_vm1, %v1917_v21 }
0x25d8   :  { %v1986_v6 = vpop.f32.mrf.mxu0 }
0x25d9   :  { %v1995_v20 = vadd.f32 %v1986_v6, %v2982_v24  ;;  %v1990_v25 = vadd.f32 %v1986_v6, %v1198_v8  ;;  %v2018_v24 = vld [vmem:[%s3141_s9 + $0x18] sm:$0xff] }
0x25da   :  { %v2494_v23 = vpop.f32.mrf.mxu0  ;;  %2496 = vmatpush3.msra.mxu1 %v2018_v24 }
0x25db   :  { %1997 = vrot.lane.b32.xlu0 %v1995_v20, %s2577_s18  ;;  %v1991_v26 = vmul.f32 0.5, %v1990_v25  ;;  %2497 = vmatprep.subr.mxu1 %v3031_v35 }
0x25dc   :  { %2498 = vmatpush3.msra.mxu1 %v2017_v28 }
0x25dd   :  { %2570 = vtanh.f32 %v1991_v26  ;;  %2499 = vmatprep.subr.mxu1 %v3031_v35 }
0x25de   :  { %2500 = vmatpush3.msra.mxu1 %v2016_v33 }
0x25df   :  { %2501 = vmatprep.subr.mxu1 %v3031_v35 }
0x25e0   :  { %2502 = vmatpush3.msra.mxu1 %v2015_v34 }
0x25ea   :  { %v2571_v0 = vpop.eup %2570 }
0x25eb   :  { %v1993_v27 = vmul.f32 0.5, %v2571_v0 }
0x25ed   :  { %v1994_v1 = vadd.f32 0.5, %v1993_v27 }
0x25ef   :  { %v2007_v37 = vsub.f32 1.0, %v1994_v1  ;;  %v2013_v39 = vmul.f32 %v1994_v1, %v1913_v4 }
0x264d   :  { %v1998_v29 = vpop.permute.xlu0 %1997 }
0x264e   :  { %v2000_v30 = vmul.f32 %v1998_v29, %v1994_v1 }
0x2650   :  { %2002 = vrot.lane.b32.xlu1 %v2000_v30, %s2577_s18 }
0x26c2   :  { %v2003_v31 = vpop.permute.xlu1 %2002 }
0x26c3   :  { %v2005_v32 = vadd.f32 %v2003_v31, %v1198_v8 }
0x26c5   :  { %2572 = vtanh.f32 %v2005_v32 }
0x26d2   :  { %v2573_v36 = vpop.eup %2572 }
0x26d3   :  { %2009 = vrot.lane.b32.xlu0 %v2573_v36, %s2578_s20 }
0x2745   :  { %v2010_v38 = vpop.permute.xlu0 %2009 }
0x2746   :  { %v2012_v40 = vmul.f32 %v2010_v38, %v2007_v37 }
0x2748   :  { %v2014_v41 = vadd.f32 %v2013_v39, %v2012_v40 }
0x274a   :  { %2027 = vrot.lane.b32.xlu1 %v2014_v41, %s2578_s20 }
0x27bc   :  { %v2028_v42 = vpop.permute.xlu1 %2027 }
0x27bd   :  { %2504 = vmatmul.mubr.msk.f32.vlgmr.msra.gmra.mxu1 %vm75_vm1, %v2028_v42 }
0x287d   :  { %v2097_v43 = vpop.f32.mrf.mxu1 }
0x287e   :  { %v2098_v35 = vadd.f32 %v2132_v7, %v2097_v43 }
0x287f   :  { %v2505_v44 = vpop.f32.mrf.mxu1 }
0x2880   :  { %2101 = vst [vmem:[%s3143_s11] sm:$0xff] %v2098_v35 }

</bundles_post_ra>
